<compile_context>
chip_gen: v7x
topology: tpu7x:2x2x1
jax: 0.10.0
libtpu: 0.0.40
codegen_flags: <defaults>
</compile_context>

<pallas_src>
import functools

import jax
import jax.numpy as jnp
from jax.experimental import pallas as pl
from jax.experimental.pallas import tpu as pltpu


def _round_up(x, m):
    return ((x + m - 1) // m) * m


def _pick_tk(n_pad, max_tk=2048):
    """Largest multiple of 128 <= max_tk that divides n_pad (n_pad % 128 == 0)."""
    best = 128
    t = 128
    while t <= min(max_tk, n_pad):
        if n_pad % t == 0:
            best = t
        t += 128
    return best


def _plan_tiles(n, hidden):
    n_pad128 = _round_up(max(n, 128), 128)
    tm = min(512, n_pad128)                      # row tile (multiple of 128)
    n_pad = _round_up(max(n, 1), tm)             # pad N to the row-tile multiple
    tk = _pick_tk(n_pad, 2048)                   # large K tile that divides n_pad
    # Keep H (double-buffered) resident in VMEM when it is small enough.
    h_resident = (2 * n_pad * hidden * 2) <= (16 << 20)
    return tm, tk, n_pad, h_resident


def _clamp_vmem(need_bytes, floor=32 << 20, cap=64 << 20):
    return int(min(max(int(need_bytes), floor), cap))


# ---------------------------------------------------------------------------
# Kernel 1: feature transform  H = X @ W   (bf16 in, f32 accumulate, bf16 out)
# ---------------------------------------------------------------------------
def _xw_kernel(x_ref, w_ref, o_ref):
    o_ref[...] = jnp.dot(
        x_ref[...], w_ref[...], preferred_element_type=jnp.float32
    ).astype(o_ref.dtype)


def feature_transform(x, w, *, tm):
    n, f = x.shape
    h = w.shape[1]
    need = 2 * tm * f * 2 + 2 * f * h * 2 + 2 * tm * h * 2 + (2 << 20)
    return pl.pallas_call(
        _xw_kernel,
        out_shape=jax.ShapeDtypeStruct((n, h), jnp.bfloat16),
        grid_spec=pltpu.PrefetchScalarGridSpec(
            num_scalar_prefetch=0,
            grid=(n // tm,),
            in_specs=[
                pl.BlockSpec((tm, f), lambda i: (i, 0)),
                pl.BlockSpec((f, h), lambda i: (0, 0)),
            ],
            out_specs=pl.BlockSpec((tm, h), lambda i: (i, 0)),
        ),
        compiler_params=pltpu.CompilerParams(
            dimension_semantics=("parallel",),
            vmem_limit_bytes=_clamp_vmem(need),
        ),
    )(x, w)


# ---------------------------------------------------------------------------
# Kernel 2: fused GCN layer-1 aggregation + next-layer feature transform
#   Y = relu(A_hat @ H + b) @ W_next
# grid = (rows, K), f32 VMEM accumulator, pl.when init/finalize on K.
# ---------------------------------------------------------------------------
def _make_agg_xw_kernel(tk, h_resident):
    def kernel(a_ref, h_ref, b_ref, w_next_ref, o_ref, acc_ref):
        k = pl.program_id(1)

        @pl.when(k == 0)
        def _init():
            acc_ref[...] = jnp.zeros_like(acc_ref)

        if h_resident:
            koff = pl.multiple_of(k * tk, tk)
            h_blk = h_ref[pl.ds(koff, tk), :]
        else:
            h_blk = h_ref[...]
        acc_ref[...] += jnp.dot(a_ref[...], h_blk,
                                preferred_element_type=jnp.float32)

        @pl.when(k == pl.num_programs(1) - 1)
        def _finalize():
            y = jnp.maximum(acc_ref[...] + b_ref[...], 0.0).astype(jnp.bfloat16)
            o_ref[...] = jnp.dot(
                y, w_next_ref[...], preferred_element_type=jnp.float32
            ).astype(o_ref.dtype)

    return kernel


def gcn_aggregate_fused_xw(a_hat, h, b, w_next, *, tm, tk, h_resident):
    n_pad, hd = h.shape
    h_out = w_next.shape[1]
    if h_resident:
        h_spec = pl.BlockSpec((n_pad, hd), lambda i, k: (0, 0))
        h_buf_bytes = 2 * n_pad * hd * 2
    else:
        h_spec = pl.BlockSpec((tk, hd), lambda i, k: (k, 0))
        h_buf_bytes = 2 * tk * hd * 2
    need = (2 * tm * tk * 2 + h_buf_bytes + tm * hd * 4
            + 2 * tm * h_out * 2 + 2 * hd * h_out * 2 + 2 * hd * 4 + (4 << 20))
    return pl.pallas_call(
        _make_agg_xw_kernel(tk, h_resident),
        out_shape=jax.ShapeDtypeStruct((n_pad, h_out), jnp.bfloat16),
        grid_spec=pltpu.PrefetchScalarGridSpec(
            num_scalar_prefetch=0,
            grid=(n_pad // tm, n_pad // tk),
            in_specs=[
                pl.BlockSpec((tm, tk), lambda i, k: (i, k)),     # A_hat tile (bf16)
                h_spec,                                          # H (bf16)
                pl.BlockSpec((1, hd), lambda i, k: (0, 0)),      # bias (f32)
                pl.BlockSpec((hd, h_out), lambda i, k: (0, 0)),  # next-layer W (bf16)
            ],
            out_specs=pl.BlockSpec((tm, h_out), lambda i, k: (i, 0)),
            scratch_shapes=[pltpu.VMEM((tm, hd), jnp.float32)],
        ),
        compiler_params=pltpu.CompilerParams(
            dimension_semantics=("parallel", "arbitrary"),
            vmem_limit_bytes=_clamp_vmem(need),
        ),
    )(a_hat, h, b, w_next)


# ---------------------------------------------------------------------------
# Kernel 3: fused GCN layer-2 aggregation + Linear + log_softmax head
#   out = log_softmax(relu(A_hat @ H + b) @ W_lin_pad + b_lin_pad)
# (classes padded to 128 lanes; padded columns: weight 0, bias -1e9)
# ---------------------------------------------------------------------------
def _make_agg_head_kernel(tk, h_resident):
    def kernel(a_ref, h_ref, b_ref, w_lin_ref, b_lin_ref, o_ref, acc_ref):
        k = pl.program_id(1)

        @pl.when(k == 0)
        def _init():
            acc_ref[...] = jnp.zeros_like(acc_ref)

        if h_resident:
            koff = pl.multiple_of(k * tk, tk)
            h_blk = h_ref[pl.ds(koff, tk), :]
        else:
            h_blk = h_ref[...]
        acc_ref[...] += jnp.dot(a_ref[...], h_blk,
                                preferred_element_type=jnp.float32)

        @pl.when(k == pl.num_programs(1) - 1)
        def _finalize():
            y = jnp.maximum(acc_ref[...] + b_ref[...], 0.0).astype(jnp.bfloat16)
            logits = jnp.dot(
                y, w_lin_ref[...], preferred_element_type=jnp.float32
            ) + b_lin_ref[...]
            m = jnp.max(logits, axis=-1, keepdims=True)
            shifted = logits - m
            lse = jnp.log(jnp.sum(jnp.exp(shifted), axis=-1, keepdims=True))
            o_ref[...] = (shifted - lse).astype(o_ref.dtype)

    return kernel


def gcn_aggregate_fused_head(a_hat, h, b, w_lin_pad, b_lin_pad, *, tm, tk,
                             h_resident):
    n_pad, hd = h.shape
    c_pad = w_lin_pad.shape[1]
    if h_resident:
        h_spec = pl.BlockSpec((n_pad, hd), lambda i, k: (0, 0))
        h_buf_bytes = 2 * n_pad * hd * 2
    else:
        h_spec = pl.BlockSpec((tk, hd), lambda i, k: (k, 0))
        h_buf_bytes = 2 * tk * hd * 2
    need = (2 * tm * tk * 2 + h_buf_bytes + tm * hd * 4
            + 2 * tm * c_pad * 4 + 2 * hd * c_pad * 2 + 2 * hd * 4
            + 2 * c_pad * 4 + (4 << 20))
    return pl.pallas_call(
        _make_agg_head_kernel(tk, h_resident),
        out_shape=jax.ShapeDtypeStruct((n_pad, c_pad), jnp.float32),
        grid_spec=pltpu.PrefetchScalarGridSpec(
            num_scalar_prefetch=0,
            grid=(n_pad // tm, n_pad // tk),
            in_specs=[
                pl.BlockSpec((tm, tk), lambda i, k: (i, k)),     # A_hat tile (bf16)
                h_spec,                                          # H (bf16)
                pl.BlockSpec((1, hd), lambda i, k: (0, 0)),      # bias (f32)
                pl.BlockSpec((hd, c_pad), lambda i, k: (0, 0)),  # classifier W (bf16)
                pl.BlockSpec((1, c_pad), lambda i, k: (0, 0)),   # classifier b (f32)
            ],
            out_specs=pl.BlockSpec((tm, c_pad), lambda i, k: (i, 0)),
            scratch_shapes=[pltpu.VMEM((tm, hd), jnp.float32)],
        ),
        compiler_params=pltpu.CompilerParams(
            dimension_semantics=("parallel", "arbitrary"),
            vmem_limit_bytes=_clamp_vmem(need),
        ),
    )(a_hat, h, b, w_lin_pad, b_lin_pad)


# ---------------------------------------------------------------------------
# Graph normalization (plain JAX glue): A_hat = D^-1/2 (A + I) D^-1/2
# Built directly at padded size, single cast to bf16.
# ---------------------------------------------------------------------------
def gcn_normalize_padded(edge_index, num_nodes, n_pad):
    src, dst = edge_index[0], edge_index[1]
    loops = jnp.arange(num_nodes, dtype=src.dtype)
    src = jnp.concatenate([src, loops])
    dst = jnp.concatenate([dst, loops])
    ones = jnp.ones(src.shape[0], dtype=jnp.float32)
    # In-degree normalization (matches PyG gcn_norm for symmetrized edge lists).
    deg = jnp.zeros((num_nodes,), jnp.float32).at[dst].add(ones)
    deg_inv_sqrt = jnp.where(deg > 0, jax.lax.rsqrt(deg), 0.0)
    norm = deg_inv_sqrt[src] * deg_inv_sqrt[dst]
    a_hat = jnp.zeros((n_pad, n_pad), jnp.float32).at[dst, src].add(norm)
    return a_hat.astype(jnp.bfloat16)


# ---------------------------------------------------------------------------
# Jitted forward
# ---------------------------------------------------------------------------
def _smgnn_forward(params, x, edge_index, *, num_classes, hidden):
    n = x.shape[0]
    tm, tk, n_pad, h_resident = _plan_tiles(n, hidden)

    a_hat = gcn_normalize_padded(edge_index, n, n_pad)          # (n_pad, n_pad) bf16

    x_pad = x if n_pad == n else jnp.pad(x, ((0, n_pad - n), (0, 0)))
    x_bf16 = x_pad.astype(jnp.bfloat16)

    tm_ft = n_pad if n_pad <= 1024 else tm

    # ---- conv1 feature transform: H1 = X @ W1 ----
    h = feature_transform(x_bf16, params["w1"], tm=tm_ft)
    # ---- conv1 aggregation + relu, fused with conv2 feature transform ----
    h = gcn_aggregate_fused_xw(a_hat, h, params["b1"], params["w2"],
                               tm=tm, tk=tk, h_resident=h_resident)
    # dropout: eval mode -> identity
    # TODO(synk): training-mode dropout via pltpu.prng_seed + prng_random_bits.
    # ---- conv2 aggregation + relu, fused with Linear + log_softmax head ----
    out = gcn_aggregate_fused_head(a_hat, h, params["b2"],
                                   params["w_lin_pad"], params["b_lin_pad"],
                                   tm=tm, tk=tk, h_resident=h_resident)
    return out[:n, :num_classes]


# ---------------------------------------------------------------------------
# Model
# ---------------------------------------------------------------------------
class SMGNNPallas:
    def __init__(self, in_channels, num_classes, number_views,
                 hidden_channels=128, key=None):
        self.in_channels = in_channels
        self.num_classes = num_classes
        self.number_views = number_views          # unused in forward (spec parity)
        self.hidden_channels = hidden_channels
        if key is None:
            key = jax.random.PRNGKey(0)
        k1, k2, k3 = jax.random.split(key, 3)

        # Deterministic glorot-style init (synthetic weights, not a checkpoint).
        s1 = (6.0 / (in_channels + hidden_channels)) ** 0.5
        s2 = (6.0 / (hidden_channels + hidden_channels)) ** 0.5
        s3 = (6.0 / (hidden_channels + num_classes)) ** 0.5
        self.w1 = jax.random.uniform(k1, (in_channels, hidden_channels),
                                     jnp.float32, -s1, s1)
        self.b1 = jnp.zeros((1, hidden_channels), jnp.float32)
        self.w2 = jax.random.uniform(k2, (hidden_channels, hidden_channels),
                                     jnp.float32, -s2, s2)
        self.b2 = jnp.zeros((1, hidden_channels), jnp.float32)
        self.w_lin = jax.random.uniform(k3, (hidden_channels, num_classes),
                                        jnp.float32, -s3, s3)
        self.b_lin = jnp.zeros((num_classes,), jnp.float32)

        # Lane-dense (128-wide) padded classifier weights for the fused head.
        self.c_pad = _round_up(num_classes, 128)
        w_pad = jnp.zeros((hidden_channels, self.c_pad), jnp.float32)
        w_pad = w_pad.at[:, :num_classes].set(self.w_lin)
        b_pad = jnp.full((1, self.c_pad), -1e9, jnp.float32)
        b_pad = b_pad.at[0, :num_classes].set(self.b_lin)

        self.params = {
            "w1": self.w1.astype(jnp.bfloat16),
            "b1": self.b1,
            "w2": self.w2.astype(jnp.bfloat16),
            "b2": self.b2,
            "w_lin_pad": w_pad.astype(jnp.bfloat16),
            "b_lin_pad": b_pad,
        }
        self._fwd = jax.jit(functools.partial(
            _smgnn_forward, num_classes=num_classes, hidden=hidden_channels))

    def __call__(self, x, edge_index):
        return self._fwd(self.params, x, edge_index)


# ---------------------------------------------------------------------------
# Pure-JAX reference (mirrors the same bf16 casting of MXU operands)
# ---------------------------------------------------------------------------
def _gcn_normalize_ref(edge_index, num_nodes):
    src, dst = edge_index[0], edge_index[1]
    loops = jnp.arange(num_nodes, dtype=src.dtype)
    src = jnp.concatenate([src, loops])
    dst = jnp.concatenate([dst, loops])
    ones = jnp.ones(src.shape[0], dtype=jnp.float32)
    deg = jnp.zeros((num_nodes,), jnp.float32).at[dst].add(ones)
    deg_inv_sqrt = jnp.where(deg > 0, 1.0 / jnp.sqrt(deg), 0.0)
    norm = deg_inv_sqrt[src] * deg_inv_sqrt[dst]
    return jnp.zeros((num_nodes, num_nodes), jnp.float32).at[dst, src].add(norm)


def reference_forward(model, x, edge_index):
    f32, bf = jnp.float32, jnp.bfloat16
    n = x.shape[0]
    a_hat = _gcn_normalize_ref(edge_index, n).astype(bf).astype(f32)
    xb = x.astype(bf).astype(f32)
    w1 = model.w1.astype(bf).astype(f32)
    w2 = model.w2.astype(bf).astype(f32)
    wl = model.w_lin.astype(bf).astype(f32)

    h = (xb @ w1).astype(bf).astype(f32)
    h = jnp.maximum(a_hat @ h + model.b1, 0.0).astype(bf).astype(f32)
    h = (h @ w2).astype(bf).astype(f32)
    h = jnp.maximum(a_hat @ h + model.b2, 0.0).astype(bf).astype(f32)

    logits = h @ wl + model.b_lin
    return jax.nn.log_softmax(logits, axis=1)


if __name__ == "__main__":
    key = jax.random.PRNGKey(0)
    k_x, k_e, k_w = jax.random.split(key, 3)

    num_nodes = 200            # not a multiple of 128 -> exercises padding path
    in_channels = 128
    hidden_channels = 128
    num_classes = 4
    number_views = 3
    num_edges = 800

    x = jax.random.normal(k_x, (num_nodes, in_channels), jnp.float32)
    edge_index = jax.random.randint(
        k_e, (2, num_edges), 0, num_nodes, dtype=jnp.int32)

    model = SMGNNPallas(in_channels, num_classes, number_views,
                        hidden_channels, key=k_w)

    out = jax.block_until_ready(model(x, edge_index))
    ref = reference_forward(model, x, edge_index)

    assert out.shape == (num_nodes, num_classes), out.shape
    assert bool(jnp.all(jnp.isfinite(out)))
    max_err = float(jnp.max(jnp.abs(out - ref)))
    assert max_err < 0.1, f"mismatch vs reference, max abs err = {max_err}"

    print("KERNEL_OK")
</pallas_src>

<mosaic_0001>
module attributes {stable_mosaic.version = 11 : i64} {
  func.func @_xw_kernel(%arg0: i32, %arg1: memref<256x128xbf16, #tpu.memory_space<vmem>>, %arg2: memref<128x128xbf16, #tpu.memory_space<vmem>>, %arg3: memref<256x128xbf16, #tpu.memory_space<vmem>>) attributes {dimension_semantics = [#tpu.dimension_semantics<parallel>], iteration_bounds = array<i64: 1>, scalar_prefetch = 0 : i64, scratch_operands = 0 : i64, tpu.core_type = #tpu.core_type<tc>, window_params = [{transform_indices = @transform_0, window_bounds = array<i64: 256, 128>}, {pipeline_mode = #tpu.pipeline_mode<synchronous>, transform_indices = @transform_1, window_bounds = array<i64: 128, 128>}, {transform_indices = @transform_2, window_bounds = array<i64: 256, 128>}]} {
    %c0 = arith.constant 0 : index
    %c0_0 = arith.constant 0 : index
    %0 = vector.load %arg1[%c0, %c0_0] : memref<256x128xbf16, #tpu.memory_space<vmem>>, vector<256x128xbf16>
    %c0_1 = arith.constant 0 : index
    %c0_2 = arith.constant 0 : index
    %1 = vector.load %arg2[%c0_1, %c0_2] : memref<128x128xbf16, #tpu.memory_space<vmem>>, vector<128x128xbf16>
    %cst = arith.constant dense<0.000000e+00> : vector<256x128xf32>
    %2 = tpu.matmul %0, %1, %cst {dimension_numbers = #tpu.dot_dimension_numbers<[1], [0], [0], [1], [0, 0, 1, 1], [], []>} : vector<256x128xbf16>, vector<128x128xbf16>, vector<256x128xf32> -> vector<256x128xf32>
    %3 = arith.truncf %2 : vector<256x128xf32> to vector<256x128xbf16>
    %c0_3 = arith.constant 0 : index
    %c0_4 = arith.constant 0 : index
    %4 = vector.load %arg3[%c0_3, %c0_4] : memref<256x128xbf16, #tpu.memory_space<vmem>>, vector<256x128xbf16>
    tpu.vector_store %arg3[%c0_3, %c0_4], %3 {strides = array<i32>} : memref<256x128xbf16, #tpu.memory_space<vmem>>, vector<256x128xbf16>,
    return
  }
  func.func @transform_0(%arg0: i32) -> (i32, i32) {
    %c0_i32 = arith.constant 0 : i32
    %c0_i32_0 = arith.constant 0 : i32
    return %arg0, %c0_i32 : i32, i32
  }
  func.func @transform_1(%arg0: i32) -> (i32, i32) {
    %c0_i32 = arith.constant 0 : i32
    %c0_i32_0 = arith.constant 0 : i32
    %c0_i32_1 = arith.constant 0 : i32
    return %c0_i32, %c0_i32_0 : i32, i32
  }
  func.func @transform_2(%arg0: i32) -> (i32, i32) {
    %c0_i32 = arith.constant 0 : i32
    %c0_i32_0 = arith.constant 0 : i32
    return %arg0, %c0_i32 : i32, i32
  }
}

module attributes {stable_mosaic.version = 11 : i64} {
  func.func @kernel(%arg0: i32, %arg1: i32, %arg2: memref<256x256xbf16, #tpu.memory_space<vmem>>, %arg3: memref<256x128xbf16, #tpu.memory_space<vmem>>, %arg4: memref<1x128xf32, #tpu.memory_space<vmem>>, %arg5: memref<128x128xbf16, #tpu.memory_space<vmem>>, %arg6: memref<256x128xbf16, #tpu.memory_space<vmem>>, %arg7: memref<256x128xf32, #tpu.memory_space<vmem>>) attributes {dimension_semantics = [#tpu.dimension_semantics<parallel>, #tpu.dimension_semantics<arbitrary>], iteration_bounds = array<i64: 1, 1>, scalar_prefetch = 0 : i64, scratch_operands = 1 : i64, tpu.core_type = #tpu.core_type<tc>, window_params = [{transform_indices = @transform_0, window_bounds = array<i64: 256, 256>}, {pipeline_mode = #tpu.pipeline_mode<synchronous>, transform_indices = @transform_1, window_bounds = array<i64: 256, 128>}, {pipeline_mode = #tpu.pipeline_mode<synchronous>, transform_indices = @transform_2, window_bounds = array<i64: 1, 128>}, {pipeline_mode = #tpu.pipeline_mode<synchronous>, transform_indices = @transform_3, window_bounds = array<i64: 128, 128>}, {transform_indices = @transform_4, window_bounds = array<i64: 256, 128>}]} {
    %c0_i32 = arith.constant 0 : i32
    %0 = arith.cmpi eq, %arg1, %c0_i32 : i32
    %1 = arith.extui %0 : i1 to i32
    %c0_i32_0 = arith.constant 0 : i32
    %2 = arith.cmpi ne, %1, %c0_i32_0 : i32
    scf.if %2 {
      %cst_9 = arith.constant 0.000000e+00 : f32
      %15 = vector.broadcast %cst_9 : f32 to vector<256x128xf32>
      %c0_10 = arith.constant 0 : index
      %c0_11 = arith.constant 0 : index
      %16 = vector.load %arg7[%c0_10, %c0_11] : memref<256x128xf32, #tpu.memory_space<vmem>>, vector<256x128xf32>
      tpu.vector_store %arg7[%c0_10, %c0_11], %15 {strides = array<i32>} : memref<256x128xf32, #tpu.memory_space<vmem>>, vector<256x128xf32>,
    } else {
    }
    %c256_i32 = arith.constant 256 : i32
    %3 = arith.muli %arg1, %c256_i32 : i32
    %4 = tpu.assume_multiple %3, 256 : i32
    %5 = arith.index_cast %4 : i32 to index
    %c0 = arith.constant 0 : index
    %6 = vector.load %arg3[%5, %c0] : memref<256x128xbf16, #tpu.memory_space<vmem>>, vector<256x128xbf16>
    %c0_1 = arith.constant 0 : index
    %c0_2 = arith.constant 0 : index
    %7 = vector.load %arg7[%c0_1, %c0_2] : memref<256x128xf32, #tpu.memory_space<vmem>>, vector<256x128xf32>
    %c0_3 = arith.constant 0 : index
    %c0_4 = arith.constant 0 : index
    %8 = vector.load %arg2[%c0_3, %c0_4] : memref<256x256xbf16, #tpu.memory_space<vmem>>, vector<256x256xbf16>
    %cst = arith.constant dense<0.000000e+00> : vector<256x128xf32>
    %9 = tpu.matmul %8, %6, %cst {dimension_numbers = #tpu.dot_dimension_numbers<[1], [0], [0], [1], [0, 0, 1, 1], [], []>} : vector<256x256xbf16>, vector<256x128xbf16>, vector<256x128xf32> -> vector<256x128xf32>
    %10 = arith.addf %7, %9 : vector<256x128xf32>
    %c0_5 = arith.constant 0 : index
    %c0_6 = arith.constant 0 : index
    %11 = vector.load %arg7[%c0_5, %c0_6] : memref<256x128xf32, #tpu.memory_space<vmem>>, vector<256x128xf32>
    tpu.vector_store %arg7[%c0_5, %c0_6], %10 {strides = array<i32>} : memref<256x128xf32, #tpu.memory_space<vmem>>, vector<256x128xf32>,
    %c0_i32_7 = arith.constant 0 : i32
    %12 = arith.cmpi eq, %arg1, %c0_i32_7 : i32
    %13 = arith.extui %12 : i1 to i32
    %c0_i32_8 = arith.constant 0 : i32
    %14 = arith.cmpi ne, %13, %c0_i32_8 : i32
    scf.if %14 {
      %c0_9 = arith.constant 0 : index
      %c0_10 = arith.constant 0 : index
      %15 = vector.load %arg7[%c0_9, %c0_10] : memref<256x128xf32, #tpu.memory_space<vmem>>, vector<256x128xf32>
      %c0_11 = arith.constant 0 : index
      %c0_12 = arith.constant 0 : index
      %16 = vector.load %arg4[%c0_11, %c0_12] : memref<1x128xf32, #tpu.memory_space<vmem>>, vector<1x128xf32>
      %17 = vector.broadcast %16 : vector<1x128xf32> to vector<256x128xf32>
      %18 = arith.addf %15, %17 : vector<256x128xf32>
      %cst_13 = arith.constant 0.000000e+00 : f32
      %19 = vector.broadcast %cst_13 : f32 to vector<256x128xf32>
      %20 = arith.maximumf %18, %19 : vector<256x128xf32>
      %21 = arith.truncf %20 : vector<256x128xf32> to vector<256x128xbf16>
      %c0_14 = arith.constant 0 : index
      %c0_15 = arith.constant 0 : index
      %22 = vector.load %arg5[%c0_14, %c0_15] : memref<128x128xbf16, #tpu.memory_space<vmem>>, vector<128x128xbf16>
      %cst_16 = arith.constant dense<0.000000e+00> : vector<256x128xf32>
      %23 = tpu.matmul %21, %22, %cst_16 {dimension_numbers = #tpu.dot_dimension_numbers<[1], [0], [0], [1], [0, 0, 1, 1], [], []>} : vector<256x128xbf16>, vector<128x128xbf16>, vector<256x128xf32> -> vector<256x128xf32>
      %24 = arith.truncf %23 : vector<256x128xf32> to vector<256x128xbf16>
      %c0_17 = arith.constant 0 : index
      %c0_18 = arith.constant 0 : index
      %25 = vector.load %arg6[%c0_17, %c0_18] : memref<256x128xbf16, #tpu.memory_space<vmem>>, vector<256x128xbf16>
      tpu.vector_store %arg6[%c0_17, %c0_18], %24 {strides = array<i32>} : memref<256x128xbf16, #tpu.memory_space<vmem>>, vector<256x128xbf16>,
    } else {
    }
    return
  }
  func.func @transform_0(%arg0: i32, %arg1: i32) -> (i32, i32) {
    %c0_i32 = arith.constant 0 : i32
    return %arg0, %arg1 : i32, i32
  }
  func.func @transform_1(%arg0: i32, %arg1: i32) -> (i32, i32) {
    %c0_i32 = arith.constant 0 : i32
    %c0_i32_0 = arith.constant 0 : i32
    %c0_i32_1 = arith.constant 0 : i32
    return %c0_i32, %c0_i32_0 : i32, i32
  }
  func.func @transform_2(%arg0: i32, %arg1: i32) -> (i32, i32) {
    %c0_i32 = arith.constant 0 : i32
    %c0_i32_0 = arith.constant 0 : i32
    %c0_i32_1 = arith.constant 0 : i32
    return %c0_i32, %c0_i32_0 : i32, i32
  }
  func.func @transform_3(%arg0: i32, %arg1: i32) -> (i32, i32) {
    %c0_i32 = arith.constant 0 : i32
    %c0_i32_0 = arith.constant 0 : i32
    %c0_i32_1 = arith.constant 0 : i32
    return %c0_i32, %c0_i32_0 : i32, i32
  }
  func.func @transform_4(%arg0: i32, %arg1: i32) -> (i32, i32) {
    %c0_i32 = arith.constant 0 : i32
    %c0_i32_0 = arith.constant 0 : i32
    return %arg0, %c0_i32 : i32, i32
  }
}

module attributes {stable_mosaic.version = 11 : i64} {
  func.func @kernel(%arg0: i32, %arg1: i32, %arg2: memref<256x256xbf16, #tpu.memory_space<vmem>>, %arg3: memref<256x128xbf16, #tpu.memory_space<vmem>>, %arg4: memref<1x128xf32, #tpu.memory_space<vmem>>, %arg5: memref<128x128xbf16, #tpu.memory_space<vmem>>, %arg6: memref<1x128xf32, #tpu.memory_space<vmem>>, %arg7: memref<256x128xf32, #tpu.memory_space<vmem>>, %arg8: memref<256x128xf32, #tpu.memory_space<vmem>>) attributes {dimension_semantics = [#tpu.dimension_semantics<parallel>, #tpu.dimension_semantics<arbitrary>], iteration_bounds = array<i64: 1, 1>, scalar_prefetch = 0 : i64, scratch_operands = 1 : i64, tpu.core_type = #tpu.core_type<tc>, window_params = [{transform_indices = @transform_0, window_bounds = array<i64: 256, 256>}, {pipeline_mode = #tpu.pipeline_mode<synchronous>, transform_indices = @transform_1, window_bounds = array<i64: 256, 128>}, {pipeline_mode = #tpu.pipeline_mode<synchronous>, transform_indices = @transform_2, window_bounds = array<i64: 1, 128>}, {pipeline_mode = #tpu.pipeline_mode<synchronous>, transform_indices = @transform_3, window_bounds = array<i64: 128, 128>}, {pipeline_mode = #tpu.pipeline_mode<synchronous>, transform_indices = @transform_4, window_bounds = array<i64: 1, 128>}, {transform_indices = @transform_5, window_bounds = array<i64: 256, 128>}]} {
    %c0_i32 = arith.constant 0 : i32
    %0 = arith.cmpi eq, %arg1, %c0_i32 : i32
    %1 = arith.extui %0 : i1 to i32
    %c0_i32_0 = arith.constant 0 : i32
    %2 = arith.cmpi ne, %1, %c0_i32_0 : i32
    scf.if %2 {
      %cst_9 = arith.constant 0.000000e+00 : f32
      %15 = vector.broadcast %cst_9 : f32 to vector<256x128xf32>
      %c0_10 = arith.constant 0 : index
      %c0_11 = arith.constant 0 : index
      %16 = vector.load %arg8[%c0_10, %c0_11] : memref<256x128xf32, #tpu.memory_space<vmem>>, vector<256x128xf32>
      tpu.vector_store %arg8[%c0_10, %c0_11], %15 {strides = array<i32>} : memref<256x128xf32, #tpu.memory_space<vmem>>, vector<256x128xf32>,
    } else {
    }
    %c256_i32 = arith.constant 256 : i32
    %3 = arith.muli %arg1, %c256_i32 : i32
    %4 = tpu.assume_multiple %3, 256 : i32
    %5 = arith.index_cast %4 : i32 to index
    %c0 = arith.constant 0 : index
    %6 = vector.load %arg3[%5, %c0] : memref<256x128xbf16, #tpu.memory_space<vmem>>, vector<256x128xbf16>
    %c0_1 = arith.constant 0 : index
    %c0_2 = arith.constant 0 : index
    %7 = vector.load %arg8[%c0_1, %c0_2] : memref<256x128xf32, #tpu.memory_space<vmem>>, vector<256x128xf32>
    %c0_3 = arith.constant 0 : index
    %c0_4 = arith.constant 0 : index
    %8 = vector.load %arg2[%c0_3, %c0_4] : memref<256x256xbf16, #tpu.memory_space<vmem>>, vector<256x256xbf16>
    %cst = arith.constant dense<0.000000e+00> : vector<256x128xf32>
    %9 = tpu.matmul %8, %6, %cst {dimension_numbers = #tpu.dot_dimension_numbers<[1], [0], [0], [1], [0, 0, 1, 1], [], []>} : vector<256x256xbf16>, vector<256x128xbf16>, vector<256x128xf32> -> vector<256x128xf32>
    %10 = arith.addf %7, %9 : vector<256x128xf32>
    %c0_5 = arith.constant 0 : index
    %c0_6 = arith.constant 0 : index
    %11 = vector.load %arg8[%c0_5, %c0_6] : memref<256x128xf32, #tpu.memory_space<vmem>>, vector<256x128xf32>
    tpu.vector_store %arg8[%c0_5, %c0_6], %10 {strides = array<i32>} : memref<256x128xf32, #tpu.memory_space<vmem>>, vector<256x128xf32>,
    %c0_i32_7 = arith.constant 0 : i32
    %12 = arith.cmpi eq, %arg1, %c0_i32_7 : i32
    %13 = arith.extui %12 : i1 to i32
    %c0_i32_8 = arith.constant 0 : i32
    %14 = arith.cmpi ne, %13, %c0_i32_8 : i32
    scf.if %14 {
      %c0_9 = arith.constant 0 : index
      %c0_10 = arith.constant 0 : index
      %15 = vector.load %arg8[%c0_9, %c0_10] : memref<256x128xf32, #tpu.memory_space<vmem>>, vector<256x128xf32>
      %c0_11 = arith.constant 0 : index
      %c0_12 = arith.constant 0 : index
      %16 = vector.load %arg4[%c0_11, %c0_12] : memref<1x128xf32, #tpu.memory_space<vmem>>, vector<1x128xf32>
      %17 = vector.broadcast %16 : vector<1x128xf32> to vector<256x128xf32>
      %18 = arith.addf %15, %17 : vector<256x128xf32>
      %cst_13 = arith.constant 0.000000e+00 : f32
      %19 = vector.broadcast %cst_13 : f32 to vector<256x128xf32>
      %20 = arith.maximumf %18, %19 : vector<256x128xf32>
      %21 = arith.truncf %20 : vector<256x128xf32> to vector<256x128xbf16>
      %c0_14 = arith.constant 0 : index
      %c0_15 = arith.constant 0 : index
      %22 = vector.load %arg5[%c0_14, %c0_15] : memref<128x128xbf16, #tpu.memory_space<vmem>>, vector<128x128xbf16>
      %cst_16 = arith.constant dense<0.000000e+00> : vector<256x128xf32>
      %23 = tpu.matmul %21, %22, %cst_16 {dimension_numbers = #tpu.dot_dimension_numbers<[1], [0], [0], [1], [0, 0, 1, 1], [], []>} : vector<256x128xbf16>, vector<128x128xbf16>, vector<256x128xf32> -> vector<256x128xf32>
      %c0_17 = arith.constant 0 : index
      %c0_18 = arith.constant 0 : index
      %24 = vector.load %arg6[%c0_17, %c0_18] : memref<1x128xf32, #tpu.memory_space<vmem>>, vector<1x128xf32>
      %25 = vector.broadcast %24 : vector<1x128xf32> to vector<256x128xf32>
      %26 = arith.addf %23, %25 : vector<256x128xf32>
      %cst_19 = arith.constant dense<0xFF800000> : vector<256xf32>
      %27 = vector.multi_reduction <maximumf>, %26, %cst_19 [1] : vector<256x128xf32> to vector<256xf32>
      %28 = vector.shape_cast %27 : vector<256xf32> to vector<256x1xf32>
      %29 = vector.broadcast %28 : vector<256x1xf32> to vector<256x128xf32>
      %30 = arith.subf %26, %29 : vector<256x128xf32>
      %31 = math.exp %30 : vector<256x128xf32>
      %cst_20 = arith.constant dense<0.000000e+00> : vector<256xf32>
      %32 = vector.multi_reduction <add>, %31, %cst_20 [1] : vector<256x128xf32> to vector<256xf32>
      %33 = vector.shape_cast %32 : vector<256xf32> to vector<256x1xf32>
      %34 = math.log %33 : vector<256x1xf32>
      %35 = vector.broadcast %34 : vector<256x1xf32> to vector<256x128xf32>
      %36 = arith.subf %30, %35 : vector<256x128xf32>
      %c0_21 = arith.constant 0 : index
      %c0_22 = arith.constant 0 : index
      %37 = vector.load %arg7[%c0_21, %c0_22] : memref<256x128xf32, #tpu.memory_space<vmem>>, vector<256x128xf32>
      tpu.vector_store %arg7[%c0_21, %c0_22], %36 {strides = array<i32>} : memref<256x128xf32, #tpu.memory_space<vmem>>, vector<256x128xf32>,
    } else {
    }
    return
  }
  func.func @transform_0(%arg0: i32, %arg1: i32) -> (i32, i32) {
    %c0_i32 = arith.constant 0 : i32
    return %arg0, %arg1 : i32, i32
  }
  func.func @transform_1(%arg0: i32, %arg1: i32) -> (i32, i32) {
    %c0_i32 = arith.constant 0 : i32
    %c0_i32_0 = arith.constant 0 : i32
    %c0_i32_1 = arith.constant 0 : i32
    return %c0_i32, %c0_i32_0 : i32, i32
  }
  func.func @transform_2(%arg0: i32, %arg1: i32) -> (i32, i32) {
    %c0_i32 = arith.constant 0 : i32
    %c0_i32_0 = arith.constant 0 : i32
    %c0_i32_1 = arith.constant 0 : i32
    return %c0_i32, %c0_i32_0 : i32, i32
  }
  func.func @transform_3(%arg0: i32, %arg1: i32) -> (i32, i32) {
    %c0_i32 = arith.constant 0 : i32
    %c0_i32_0 = arith.constant 0 : i32
    %c0_i32_1 = arith.constant 0 : i32
    return %c0_i32, %c0_i32_0 : i32, i32
  }
  func.func @transform_4(%arg0: i32, %arg1: i32) -> (i32, i32) {
    %c0_i32 = arith.constant 0 : i32
    %c0_i32_0 = arith.constant 0 : i32
    %c0_i32_1 = arith.constant 0 : i32
    return %c0_i32, %c0_i32_0 : i32, i32
  }
  func.func @transform_5(%arg0: i32, %arg1: i32) -> (i32, i32) {
    %c0_i32 = arith.constant 0 : i32
    %c0_i32_0 = arith.constant 0 : i32
    return %arg0, %c0_i32 : i32, i32
  }
}

</mosaic_0001>

<bundles_post_ra>
// kernel: mul.1
= control target key start
LH: loop header
LB: loop body
LE: loop exit
PB: predicated region body
PF: predicated region fallthrough
CT: control target
= control target key end

     0   :  { %s34_s0 = inlined_call_operand.vmem [shape: f32[1000], index: 0, kind: input, shape index: {}]   ;;  %s35_s1 = inlined_call_operand.vmem [shape: f32[1000], index: 1, kind: input, shape index: {}]   ;;  %s36_s2 = inlined_call_operand.vmem [shape: f32[1000], index: 2, kind: output, shape index: {}]  }
   0x1   :  { %v3_v0 = vld [vmem:[%s34_s0] sm:$0xff] }
   0x2   :  { %v4_v1 = vld [vmem:[%s35_s1] sm:$0xff] }
   0x3   :  { %v7_v2 = vmul.f32 %v4_v1, %v3_v0 }
   0x5   :  { %9 = vst [vmem:[%s36_s2] sm:$0xff] %v7_v2 }

// kernel: _smgnn_forward.3
= control target key start
LH: loop header
LB: loop body
LE: loop exit
PB: predicated region body
PF: predicated region fallthrough
CT: control target
= control target key end

     0   :  { %s959_s1 = inlined_call_operand.vmem [shape: bf16[128,128], index: 1, kind: input, shape index: {}]   ;;  %s960_s0 = inlined_call_operand.vmem [shape: bf16[256,128], index: 0, kind: input, shape index: {}]   ;;  %s961_s2 = inlined_call_operand.vmem [shape: bf16[256,128], index: 2, kind: output, shape index: {}]  }
   0x1   :  { %v800_v0 = vld [vmem:[%s959_s1] sm:$0xff]   ;;  %v801_v1 = vld [vmem:[%s959_s1 + $0x8] sm:$0xff]   ;;  %v802_v2 = vld [vmem:[%s959_s1 + $0x10] sm:$0xff]  }
   0x2   :  { %736 = vmatprep.subr.bf16.mxu0 %v800_v0  ;;  %784 = vmatprep.subr.bf16.mxu1 %v800_v0  ;;  %v803_v3 = vld [vmem:[%s959_s1 + $0x18] sm:$0xff]   ;;  %v808_v4 = vld [vmem:[%s960_s0] sm:$0xff]   ;;  %v805_v7 = vld [vmem:[%s959_s1 + $0x28] sm:$0xff]  }
   0x3   :  { %737 = vmatpush3.bf16.msra.mxu0 %v800_v0  ;;  %792 = vmatpush3.bf16.msra.mxu1 %v800_v0  ;;  %v809_v5 = vld [vmem:[%s960_s0 + $0x40] sm:$0xff]   ;;  %v806_v8 = vld [vmem:[%s959_s1 + $0x30] sm:$0xff]   ;;  %v807_v9 = vld [vmem:[%s959_s1 + $0x38] sm:$0xff]  }
   0x4   :  { %738 = vmatprep.subr.bf16.mxu0 %v801_v1  ;;  %785 = vmatprep.subr.bf16.mxu1 %v801_v1  ;;  %v804_v6 = vld [vmem:[%s959_s1 + $0x20] sm:$0xff]   ;;  %v810_v10 = vld [vmem:[%s960_s0 + $0x8] sm:$0xff]   ;;  %v812_v12 = vld [vmem:[%s960_s0 + $0x10] sm:$0xff]  }
   0x5   :  { %752 = vmatprep.mubr.bf16.mxu0 %v808_v4  ;;  %768 = vmatprep.mubr.bf16.mxu1 %v809_v5  ;;  %v811_v11 = vld [vmem:[%s960_s0 + $0x48] sm:$0xff]   ;;  %v813_v13 = vld [vmem:[%s960_s0 + $0x50] sm:$0xff]   ;;  %v814_v14 = vld [vmem:[%s960_s0 + $0x18] sm:$0xff]  }
   0x6   :  { %v815_v15 = vld [vmem:[%s960_s0 + $0x58] sm:$0xff]   ;;  %v816_v16 = vld [vmem:[%s960_s0 + $0x20] sm:$0xff]   ;;  %v818_v18 = vld [vmem:[%s960_s0 + $0x28] sm:$0xff]  }
   0x7   :  { %739 = vmatpush3.bf16.msra.mxu0 %v801_v1  ;;  %793 = vmatpush3.bf16.msra.mxu1 %v801_v1  ;;  %v817_v17 = vld [vmem:[%s960_s0 + $0x60] sm:$0xff]   ;;  %v819_v19 = vld [vmem:[%s960_s0 + $0x68] sm:$0xff]   ;;  %v820_v20 = vld [vmem:[%s960_s0 + $0x30] sm:$0xff]  }
   0x8   :  { %740 = vmatprep.subr.bf16.mxu0 %v802_v2  ;;  %786 = vmatprep.subr.bf16.mxu1 %v802_v2  ;;  %v821_v21 = vld [vmem:[%s960_s0 + $0x70] sm:$0xff]   ;;  %v822_v22 = vld [vmem:[%s960_s0 + $0x38] sm:$0xff]  }
   0x9   :  { %v823_v23 = vld [vmem:[%s960_s0 + $0x78] sm:$0xff]  }
   0xb   :  { %741 = vmatpush3.bf16.msra.mxu0 %v802_v2  ;;  %794 = vmatpush3.bf16.msra.mxu1 %v802_v2 }
   0xc   :  { %742 = vmatprep.subr.bf16.mxu0 %v803_v3  ;;  %787 = vmatprep.subr.bf16.mxu1 %v803_v3 }
   0xf   :  { %743 = vmatpush3.bf16.msra.mxu0 %v803_v3  ;;  %795 = vmatpush3.bf16.msra.mxu1 %v803_v3 }
  0x10   :  { %744 = vmatprep.subr.bf16.mxu0 %v804_v6  ;;  %788 = vmatprep.subr.bf16.mxu1 %v804_v6 }
  0x13   :  { %745 = vmatpush3.bf16.msra.mxu0 %v804_v6  ;;  %796 = vmatpush3.bf16.msra.mxu1 %v804_v6 }
  0x14   :  { %746 = vmatprep.subr.bf16.mxu0 %v805_v7  ;;  %789 = vmatprep.subr.bf16.mxu1 %v805_v7 }
  0x17   :  { %747 = vmatpush3.bf16.msra.mxu0 %v805_v7  ;;  %797 = vmatpush3.bf16.msra.mxu1 %v805_v7 }
  0x18   :  { %748 = vmatprep.subr.bf16.mxu0 %v806_v8  ;;  %790 = vmatprep.subr.bf16.mxu1 %v806_v8 }
  0x1b   :  { %749 = vmatpush3.bf16.msra.mxu0 %v806_v8  ;;  %798 = vmatpush3.bf16.msra.mxu1 %v806_v8 }
  0x1c   :  { %750 = vmatprep.subr.bf16.mxu0 %v807_v9  ;;  %791 = vmatprep.subr.bf16.mxu1 %v807_v9 }
  0x1f   :  { %751 = vmatpush3.bf16.msra.mxu0 %v807_v9  ;;  %799 = vmatpush3.bf16.msra.mxu1 %v807_v9 }
  0x22   :  { %753 = vmatmul.mubr.bf16.vlgmr.msra.gmra.mrb[0].mxu0 %v810_v10  ;;  %769 = vmatmul.mubr.bf16.vlgmr.msra.gmra.mrb[0].mxu1 %v811_v11 }
  0x23   :  { %756 = vmatprep.mubr.bf16.mxu0 %v812_v12  ;;  %772 = vmatprep.mubr.bf16.mxu1 %v813_v13 }
  0x2a   :  { %757 = vmatmul.mubr.bf16.gmra.mrb[4].mxu0 %v814_v14  ;;  %773 = vmatmul.mubr.bf16.gmra.mrb[4].mxu1 %v815_v15 }
  0x2b   :  { %760 = vmatprep.mubr.bf16.mxu0 %v816_v16  ;;  %776 = vmatprep.mubr.bf16.mxu1 %v817_v17 }
  0x32   :  { %761 = vmatmul.mubr.bf16.gmra.mrb[8].mxu0 %v818_v18  ;;  %777 = vmatmul.mubr.bf16.gmra.mrb[8].mxu1 %v819_v19 }
  0x33   :  { %764 = vmatprep.mubr.bf16.mxu0 %v820_v20  ;;  %780 = vmatprep.mubr.bf16.mxu1 %v821_v21 }
  0x3a   :  { %765 = vmatmul.mubr.bf16.gmra.mrb[12].mxu0 %v822_v22  ;;  %781 = vmatmul.mubr.bf16.gmra.mrb[12].mxu1 %v823_v23 }
  0xf5   :  { %v754_v24 = vpop.f32.mrb[0].mxu0  ;;  %v770_v25 = vpop.f32.mrb[0].mxu1 }
  0xf6   :  { %v238_v26 = vpop.f32.mrb[1].mxu0  ;;  %v302_v27 = vpop.f32.mrb[1].mxu1 }
  0xf7   :  { %v755_v28 = vpop.f32.mrb[2].mxu0  ;;  %v771_v29 = vpop.f32.mrb[2].mxu1 }
  0xf8   :  { %v625_v30 = vpack.c.bf16 %v755_v28, %v754_v24  ;;  %v665_v31 = vpack.c.bf16 %v771_v29, %v770_v25  ;;  %v241_v32 = vpop.f32.mrb[3].mxu0  ;;  %v305_v33 = vpop.f32.mrb[3].mxu1 }
  0xf9   :  { %v620_v34 = vpack.c.bf16 %v241_v32, %v238_v26  ;;  %v660_v35 = vpack.c.bf16 %v305_v33, %v302_v27 }
  0xfa   :  { %697 = vst [vmem:[%s961_s2 + $0x8] sm:$0xff] %v625_v30   ;;  %705 = vst [vmem:[%s961_s2 + $0x48] sm:$0xff] %v665_v31  }
  0xfb   :  { %621 = vst [vmem:[%s961_s2] sm:$0xff] %v620_v34   ;;  %704 = vst [vmem:[%s961_s2 + $0x40] sm:$0xff] %v660_v35  }
  0xfd   :  { %v758_v36 = vpop.f32.mrb[4].mxu0  ;;  %v774_v37 = vpop.f32.mrb[4].mxu1 }
  0xfe   :  { %v254_v38 = vpop.f32.mrb[5].mxu0  ;;  %v318_v39 = vpop.f32.mrb[5].mxu1 }
  0xff   :  { %v759_v40 = vpop.f32.mrb[6].mxu0  ;;  %v775_v41 = vpop.f32.mrb[6].mxu1 }
 0x100   :  { %v635_v42 = vpack.c.bf16 %v759_v40, %v758_v36  ;;  %v675_v43 = vpack.c.bf16 %v775_v41, %v774_v37  ;;  %v257_v44 = vpop.f32.mrb[7].mxu0  ;;  %v321_v45 = vpop.f32.mrb[7].mxu1 }
 0x101   :  { %v630_v46 = vpack.c.bf16 %v257_v44, %v254_v38  ;;  %v670_v47 = vpack.c.bf16 %v321_v45, %v318_v39 }
 0x102   :  { %699 = vst [vmem:[%s961_s2 + $0x18] sm:$0xff] %v635_v42   ;;  %707 = vst [vmem:[%s961_s2 + $0x58] sm:$0xff] %v675_v43  }
 0x103   :  { %698 = vst [vmem:[%s961_s2 + $0x10] sm:$0xff] %v630_v46   ;;  %706 = vst [vmem:[%s961_s2 + $0x50] sm:$0xff] %v670_v47  }
 0x105   :  { %v762_v48 = vpop.f32.mrb[8].mxu0  ;;  %v778_v49 = vpop.f32.mrb[8].mxu1 }
 0x106   :  { %v270_v50 = vpop.f32.mrb[9].mxu0  ;;  %v334_v51 = vpop.f32.mrb[9].mxu1 }
 0x107   :  { %v763_v52 = vpop.f32.mrb[10].mxu0  ;;  %v779_v53 = vpop.f32.mrb[10].mxu1 }
 0x108   :  { %v645_v54 = vpack.c.bf16 %v763_v52, %v762_v48  ;;  %v685_v55 = vpack.c.bf16 %v779_v53, %v778_v49  ;;  %v273_v56 = vpop.f32.mrb[11].mxu0  ;;  %v337_v57 = vpop.f32.mrb[11].mxu1 }
 0x109   :  { %v640_v58 = vpack.c.bf16 %v273_v56, %v270_v50  ;;  %v680_v59 = vpack.c.bf16 %v337_v57, %v334_v51 }
 0x10a   :  { %701 = vst [vmem:[%s961_s2 + $0x28] sm:$0xff] %v645_v54   ;;  %709 = vst [vmem:[%s961_s2 + $0x68] sm:$0xff] %v685_v55  }
 0x10b   :  { %700 = vst [vmem:[%s961_s2 + $0x20] sm:$0xff] %v640_v58   ;;  %708 = vst [vmem:[%s961_s2 + $0x60] sm:$0xff] %v680_v59  }
 0x10d   :  { %v766_v60 = vpop.f32.mrb[12].mxu0  ;;  %v782_v61 = vpop.f32.mrb[12].mxu1 }
 0x10e   :  { %v286_v62 = vpop.f32.mrb[13].mxu0  ;;  %v350_v63 = vpop.f32.mrb[13].mxu1 }
 0x10f   :  { %v767_v0 = vpop.f32.mrb[14].mxu0  ;;  %v783_v1 = vpop.f32.mrb[14].mxu1 }
 0x110   :  { %v655_v2 = vpack.c.bf16 %v767_v0, %v766_v60  ;;  %v695_v3 = vpack.c.bf16 %v783_v1, %v782_v61  ;;  %v289_v4 = vpop.f32.mrb[15].mxu0  ;;  %v353_v5 = vpop.f32.mrb[15].mxu1 }
 0x111   :  { %v650_v6 = vpack.c.bf16 %v289_v4, %v286_v62  ;;  %v690_v7 = vpack.c.bf16 %v353_v5, %v350_v63 }
 0x112   :  { %703 = vst [vmem:[%s961_s2 + $0x38] sm:$0xff] %v655_v2   ;;  %711 = vst [vmem:[%s961_s2 + $0x78] sm:$0xff] %v695_v3  }
 0x113   :  { %702 = vst [vmem:[%s961_s2 + $0x30] sm:$0xff] %v650_v6   ;;  %710 = vst [vmem:[%s961_s2 + $0x70] sm:$0xff] %v690_v7  }

// kernel: _smgnn_forward.4
= control target key start
LH: loop header
LB: loop body
LE: loop exit
PB: predicated region body
PF: predicated region fallthrough
CT: control target
= control target key end

     0   :  { %s1927_s1 = inlined_call_operand.vmem [shape: bf16[256,128], index: 1, kind: input, shape index: {}]   ;;  %s1928_s0 = inlined_call_operand.vmem [shape: bf16[256,256], index: 0, kind: input, shape index: {}]   ;;  %s1929_s3 = inlined_call_operand.vmem [shape: bf16[128,128], index: 3, kind: input, shape index: {}]   ;;  %s1930_s2 = inlined_call_operand.vmem [shape: f32[1,128], index: 2, kind: input, shape index: {}]   ;;  %s1931_s4 = inlined_call_operand.vmem [shape: bf16[256,128], index: 4, kind: output, shape index: {}]  }
   0x1   :  { %v1565_v0 = vld [vmem:[%s1927_s1 + $0x40] sm:$0xff]   ;;  %v1567_v2 = vld [vmem:[%s1927_s1 + $0x48] sm:$0xff]   ;;  %v1569_v4 = vld [vmem:[%s1927_s1 + $0x50] sm:$0xff]  }
   0x2   :  { %v1566_v1 = vld [vmem:[%s1927_s1] sm:$0xff]   ;;  %1365 = vmatprep.subr.bf16.mxu0 %v1565_v0  ;;  %1549 = vmatprep.subr.bf16.mxu1 %v1565_v0  ;;  %v1568_v3 = vld [vmem:[%s1927_s1 + $0x8] sm:$0xff]   ;;  %v1570_v5 = vld [vmem:[%s1927_s1 + $0x10] sm:$0xff]  }
   0x3   :  { %1366 = vmatpush3.bf16.msra.mxu0 %v1566_v1  ;;  %1557 = vmatpush3.bf16.msra.mxu1 %v1566_v1  ;;  %v1571_v6 = vld [vmem:[%s1927_s1 + $0x58] sm:$0xff]   ;;  %v1573_v8 = vld [vmem:[%s1927_s1 + $0x60] sm:$0xff]   ;;  %v1575_v10 = vld [vmem:[%s1927_s1 + $0x68] sm:$0xff]  }
   0x4   :  { %1367 = vmatprep.subr.bf16.mxu0 %v1567_v2  ;;  %1550 = vmatprep.subr.bf16.mxu1 %v1567_v2  ;;  %v1572_v7 = vld [vmem:[%s1927_s1 + $0x18] sm:$0xff]   ;;  %v1574_v9 = vld [vmem:[%s1927_s1 + $0x20] sm:$0xff]   ;;  %v1576_v12 = vld [vmem:[%s1927_s1 + $0x28] sm:$0xff]  }
   0x5   :  { %v1583_v11 = vld [vmem:[%s1928_s0 + $0x4] ss:$8 sps:$4 sm:$0xff]   ;;  %v1577_v13 = vld [vmem:[%s1927_s1 + $0x70] sm:$0xff]   ;;  %v1579_v15 = vld [vmem:[%s1927_s1 + $0x78] sm:$0xff]  }
   0x6   :  { %443 = vmatprep.mubr.bf16.mxu0 %v1583_v11  ;;  %v1578_v14 = vld [vmem:[%s1927_s1 + $0x30] sm:$0xff]   ;;  %v1580_v16 = vld [vmem:[%s1927_s1 + $0x38] sm:$0xff]   ;;  %v1581_v17 = vld [vmem:[%s1928_s0] ss:$8 sps:$4 sm:$0xff]  }
   0x7   :  { %1368 = vmatpush3.bf16.msra.mxu0 %v1568_v3  ;;  %1558 = vmatpush3.bf16.msra.mxu1 %v1568_v3  ;;  %v1613_v18 = vld [vmem:[%s1928_s0 + $0xc4] ss:$8 sps:$4 sm:$0xff]   ;;  %v1584_v19 = vld [vmem:[%s1928_s0 + $0x14] ss:$8 sps:$4 sm:$0xff]   ;;  %v1611_v20 = vld [vmem:[%s1928_s0 + $0xc0] ss:$8 sps:$4 sm:$0xff]  }
   0x8   :  { %1369 = vmatprep.subr.bf16.mxu0 %v1569_v4  ;;  %1551 = vmatprep.subr.bf16.mxu1 %v1569_v4  ;;  %v1617_v21 = vld [vmem:[%s1928_s0 + $0xd4] ss:$8 sps:$4 sm:$0xff]   ;;  %v1586_v22 = vld [vmem:[%s1928_s0 + $0x10] ss:$8 sps:$4 sm:$0xff]   ;;  %v1587_v23 = vld [vmem:[%s1928_s0 + $0x24] ss:$8 sps:$4 sm:$0xff]  }
   0x9   :  { %539 = vmatprep.mubr.bf16.mxu1 %v1613_v18  ;;  %v1619_v24 = vld [vmem:[%s1928_s0 + $0xd0] ss:$8 sps:$4 sm:$0xff]   ;;  %v1623_v25 = vld [vmem:[%s1928_s0 + $0xe4] ss:$8 sps:$4 sm:$0xff]   ;;  %v1589_v29 = vld [vmem:[%s1928_s0 + $0x20] ss:$8 sps:$4 sm:$0xff]  }
   0xa   :  { %v1629_v26 = vld [vmem:[%s1929_s3] sm:$0xff]   ;;  %v1630_v27 = vld [vmem:[%s1929_s3 + $0x8] sm:$0xff]   ;;  %v1631_v28 = vld [vmem:[%s1929_s3 + $0x10] sm:$0xff]  }
   0xb   :  { %1370 = vmatpush3.bf16.msra.mxu0 %v1570_v5  ;;  %1559 = vmatpush3.bf16.msra.mxu1 %v1570_v5  ;;  %v1590_v30 = vld [vmem:[%s1928_s0 + $0x34] ss:$8 sps:$4 sm:$0xff]   ;;  %v1625_v31 = vld [vmem:[%s1928_s0 + $0xe0] ss:$8 sps:$4 sm:$0xff]   ;;  %v1592_v33 = vld [vmem:[%s1928_s0 + $0x30] ss:$8 sps:$4 sm:$0xff]  }
   0xc   :  { %1371 = vmatprep.subr.bf16.mxu0 %v1571_v6  ;;  %1552 = vmatprep.subr.bf16.mxu1 %v1571_v6  ;;  %v1626_v32 = vld [vmem:[%s1928_s0 + $0xf4] ss:$8 sps:$4 sm:$0xff]   ;;  %v1593_v34 = vld [vmem:[%s1928_s0 + $0x44] ss:$8 sps:$4 sm:$0xff]   ;;  %v1628_v35 = vld [vmem:[%s1928_s0 + $0xf0] ss:$8 sps:$4 sm:$0xff]  }
   0xd   :  { %v1595_v36 = vld [vmem:[%s1928_s0 + $0x40] ss:$8 sps:$4 sm:$0xff]   ;;  %v1596_v37 = vld [vmem:[%s1928_s0 + $0x54] ss:$8 sps:$4 sm:$0xff]   ;;  %v1598_v38 = vld [vmem:[%s1928_s0 + $0x50] ss:$8 sps:$4 sm:$0xff]  }
   0xe   :  { %v1599_v39 = vld [vmem:[%s1928_s0 + $0x64] ss:$8 sps:$4 sm:$0xff]   ;;  %v1601_v40 = vld [vmem:[%s1928_s0 + $0x60] ss:$8 sps:$4 sm:$0xff]   ;;  %v1602_v41 = vld [vmem:[%s1928_s0 + $0x74] ss:$8 sps:$4 sm:$0xff]  }
   0xf   :  { %1372 = vmatpush3.bf16.msra.mxu0 %v1572_v7  ;;  %1560 = vmatpush3.bf16.msra.mxu1 %v1572_v7  ;;  %v1604_v42 = vld [vmem:[%s1928_s0 + $0x70] ss:$8 sps:$4 sm:$0xff]   ;;  %v1605_v43 = vld [vmem:[%s1928_s0 + $0x84] ss:$8 sps:$4 sm:$0xff]   ;;  %v1607_v44 = vld [vmem:[%s1928_s0 + $0x80] ss:$8 sps:$4 sm:$0xff]  }
  0x10   :  { %1373 = vmatprep.subr.bf16.mxu0 %v1573_v8  ;;  %1553 = vmatprep.subr.bf16.mxu1 %v1573_v8  ;;  %v1608_v45 = vld [vmem:[%s1928_s0 + $0x94] ss:$8 sps:$4 sm:$0xff]   ;;  %v1610_v46 = vld [vmem:[%s1928_s0 + $0x90] ss:$8 sps:$4 sm:$0xff]   ;;  %v1614_v47 = vld [vmem:[%s1928_s0 + $0xa4] ss:$8 sps:$4 sm:$0xff]  }
  0x11   :  { %v1616_v48 = vld [vmem:[%s1928_s0 + $0xa0] ss:$8 sps:$4 sm:$0xff]   ;;  %v1620_v49 = vld [vmem:[%s1928_s0 + $0xb4] ss:$8 sps:$4 sm:$0xff]   ;;  %v1622_v51 = vld [vmem:[%s1928_s0 + $0xb0] ss:$8 sps:$4 sm:$0xff]  }
  0x12   :  { %v1632_v50 = vld [vmem:[%s1929_s3 + $0x18] sm:$0xff]   ;;  %v1633_v52 = vld [vmem:[%s1929_s3 + $0x20] sm:$0xff]   ;;  %v1634_v53 = vld [vmem:[%s1929_s3 + $0x28] sm:$0xff]  }
  0x13   :  { %1374 = vmatpush3.bf16.msra.mxu0 %v1574_v9  ;;  %1561 = vmatpush3.bf16.msra.mxu1 %v1574_v9  ;;  %v1635_v54 = vld [vmem:[%s1929_s3 + $0x30] sm:$0xff]   ;;  %v1636_v55 = vld [vmem:[%s1929_s3 + $0x38] sm:$0xff]   ;;  %v1833_v58 = vld [vmem:[%s1930_s2] ss:$0 sm:$0xff] }
  0x14   :  { %1375 = vmatprep.subr.bf16.mxu0 %v1575_v10  ;;  %1554 = vmatprep.subr.bf16.mxu1 %v1575_v10 }
  0x17   :  { %1376 = vmatpush3.bf16.msra.mxu0 %v1576_v12  ;;  %1562 = vmatpush3.bf16.msra.mxu1 %v1576_v12 }
  0x18   :  { %1377 = vmatprep.subr.bf16.mxu0 %v1577_v13  ;;  %1555 = vmatprep.subr.bf16.mxu1 %v1577_v13 }
  0x1b   :  { %1378 = vmatpush3.bf16.msra.mxu0 %v1578_v14  ;;  %1563 = vmatpush3.bf16.msra.mxu1 %v1578_v14 }
  0x1c   :  { %1379 = vmatprep.subr.bf16.mxu0 %v1579_v15  ;;  %1556 = vmatprep.subr.bf16.mxu1 %v1579_v15 }
  0x1f   :  { %1380 = vmatpush3.bf16.msra.mxu0 %v1580_v16  ;;  %1564 = vmatpush3.bf16.msra.mxu1 %v1580_v16 }
  0x20   :  { %1501 = vmatprep.subr.bf16.mxu1 %v1629_v26 }
  0x22   :  { %444 = vmatmul.mubr.bf16.vlgmr.msra.gmra.mrb[0].mxu0 %v1581_v17  ;;  %540 = vmatmul.mubr.bf16.vlgmr.msra.gmra.mrb[0].mxu1 %v1611_v20 }
  0x23   :  { %451 = vmatprep.mubr.bf16.mxu0 %v1584_v19  ;;  %547 = vmatprep.mubr.bf16.mxu1 %v1617_v21 }
  0x24   :  { %1502 = vmatpush3.bf16.msra.mxu1 %v1629_v26 }
  0x25   :  { %1503 = vmatprep.subr.bf16.mxu1 %v1630_v27 }
  0x28   :  { %1504 = vmatpush3.bf16.msra.mxu1 %v1630_v27 }
  0x29   :  { %1505 = vmatprep.subr.bf16.mxu1 %v1631_v28 }
  0x2a   :  { %452 = vmatmul.mubr.bf16.gmra.mrb[4].mxu0 %v1586_v22  ;;  %548 = vmatmul.mubr.bf16.gmra.mrb[4].mxu1 %v1619_v24 }
  0x2b   :  { %459 = vmatprep.mubr.bf16.mxu0 %v1587_v23  ;;  %555 = vmatprep.mubr.bf16.mxu1 %v1623_v25 }
  0x2c   :  { %1506 = vmatpush3.bf16.msra.mxu1 %v1631_v28 }
  0x2d   :  { %1507 = vmatprep.subr.bf16.mxu1 %v1632_v50 }
  0x30   :  { %1508 = vmatpush3.bf16.msra.mxu1 %v1632_v50 }
  0x31   :  { %1509 = vmatprep.subr.bf16.mxu1 %v1633_v52 }
  0x32   :  { %460 = vmatmul.mubr.bf16.gmra.mrb[8].mxu0 %v1589_v29  ;;  %556 = vmatmul.mubr.bf16.gmra.mrb[8].mxu1 %v1625_v31 }
  0x33   :  { %467 = vmatprep.mubr.bf16.mxu0 %v1590_v30  ;;  %563 = vmatprep.mubr.bf16.mxu1 %v1626_v32 }
  0x34   :  { %1510 = vmatpush3.bf16.msra.mxu1 %v1633_v52 }
  0x35   :  { %1511 = vmatprep.subr.bf16.mxu1 %v1634_v53 }
  0x38   :  { %1512 = vmatpush3.bf16.msra.mxu1 %v1634_v53 }
  0x39   :  { %1513 = vmatprep.subr.bf16.mxu1 %v1635_v54 }
  0x3a   :  { %468 = vmatmul.mubr.bf16.gmra.mrb[12].mxu0 %v1592_v33  ;;  %564 = vmatmul.mubr.bf16.gmra.mrb[12].mxu1 %v1628_v35 }
  0x3b   :  { %475 = vmatprep.mubr.bf16.mxu0 %v1593_v34 }
  0x3c   :  { %1514 = vmatpush3.bf16.msra.mxu1 %v1635_v54 }
  0x3d   :  { %1515 = vmatprep.subr.bf16.mxu1 %v1636_v55 }
  0x40   :  { %1516 = vmatpush3.bf16.msra.mxu1 %v1636_v55 }
  0x42   :  { %476 = vmatmul.mubr.bf16.gmra.mrb[16].mxu0 %v1595_v36 }
  0x43   :  { %483 = vmatprep.mubr.bf16.mxu0 %v1596_v37 }
  0x4a   :  { %484 = vmatmul.mubr.bf16.gmra.mrb[20].mxu0 %v1598_v38 }
  0x4b   :  { %491 = vmatprep.mubr.bf16.mxu0 %v1599_v39 }
  0x52   :  { %492 = vmatmul.mubr.bf16.gmra.mrb[24].mxu0 %v1601_v40 }
  0x53   :  { %499 = vmatprep.mubr.bf16.mxu0 %v1602_v41 }
  0x5a   :  { %500 = vmatmul.mubr.bf16.gmra.mrb[28].mxu0 %v1604_v42 }
  0x5b   :  { %507 = vmatprep.mubr.bf16.mxu0 %v1605_v43 }
  0x62   :  { %508 = vmatmul.mubr.bf16.gmra.mrb[32].mxu0 %v1607_v44 }
  0x63   :  { %515 = vmatprep.mubr.bf16.mxu0 %v1608_v45 }
  0x6a   :  { %516 = vmatmul.mubr.bf16.gmra.mrb[36].mxu0 %v1610_v46 }
  0x6b   :  { %523 = vmatprep.mubr.bf16.mxu0 %v1614_v47 }
  0x72   :  { %524 = vmatmul.mubr.bf16.gmra.mrb[40].mxu0 %v1616_v48 }
  0x73   :  { %531 = vmatprep.mubr.bf16.mxu0 %v1620_v49 }
  0x7a   :  { %532 = vmatmul.mubr.bf16.gmra.mrb[44].mxu0 %v1622_v51 }
  0xf5   :  { %v1381_v56 = vpop.f32.mrb[0].mxu0  ;;  %v1453_v59 = vpop.f32.mrb[0].mxu1 }
  0xf6   :  { %v1382_v57 = vpop.f32.mrb[1].mxu0  ;;  %v1454_v62 = vpop.f32.mrb[1].mxu1 }
  0xf7   :  { %v1383_v60 = vadd.f32 %v1382_v57, %v1381_v56  ;;  %v1384_v61 = vpop.f32.mrb[2].mxu0  ;;  %v1455_v0 = vadd.f32 %v1454_v62, %v1453_v59  ;;  %v1456_v1 = vpop.f32.mrb[2].mxu1 }
  0xf8   :  { %v1385_v63 = vpop.f32.mrb[3].mxu0  ;;  %v1457_v4 = vpop.f32.mrb[3].mxu1 }
  0xf9   :  { %v678_v2 = vadd.f32 %v1383_v60, %v1833_v58  ;;  %v1386_v3 = vadd.f32 %v1385_v63, %v1384_v61  ;;  %v702_v5 = vadd.f32 %v1455_v0, %v1833_v58  ;;  %v1458_v6 = vadd.f32 %v1457_v4, %v1456_v1 }
  0xfb   :  { %v679_v7 = vadd.f32 %v1386_v3, %v1833_v58  ;;  %v734_v8 = vmax.f32 %v702_v5, 0.0  ;;  %v703_v9 = vadd.f32 %v1458_v6, %v1833_v58  ;;  %v710_v10 = vmax.f32 %v678_v2, 0.0 }
  0xfd   :  { %v711_v11 = vmax.f32 %v679_v7, 0.0  ;;  %v1387_v12 = vpop.f32.mrb[4].mxu0  ;;  %v735_v14 = vmax.f32 %v703_v9, 0.0  ;;  %v1459_v15 = vpop.f32.mrb[4].mxu1 }
  0xfe   :  { %v1388_v13 = vpop.f32.mrb[5].mxu0  ;;  %v1460_v19 = vpop.f32.mrb[5].mxu1 }
  0xff   :  { %v1389_v16 = vadd.f32 %v1388_v13, %v1387_v12  ;;  %v1390_v17 = vpop.f32.mrb[6].mxu0  ;;  %v742_v18 = vpack.c.bf16 %v711_v11, %v710_v10  ;;  %v1461_v21 = vadd.f32 %v1460_v19, %v1459_v15  ;;  %v1462_v22 = vpop.f32.mrb[6].mxu1  ;;  %v1839_v23 = vpack.c.bf16 %v735_v14, %v734_v8 }
 0x100   :  { %v1391_v20 = vpop.f32.mrb[7].mxu0  ;;  %v1463_v26 = vpop.f32.mrb[7].mxu1 }
 0x101   :  { %v680_v24 = vadd.f32 %v1389_v16, %v1833_v58  ;;  %v1392_v25 = vadd.f32 %v1391_v20, %v1390_v17  ;;  %1517 = vmatprep.mubr.bf16.mxu1 %v742_v18  ;;  %v704_v27 = vadd.f32 %v1461_v21, %v1833_v58  ;;  %v1464_v28 = vadd.f32 %v1463_v26, %v1462_v22 }
 0x103   :  { %v681_v29 = vadd.f32 %v1392_v25, %v1833_v58  ;;  %v736_v30 = vmax.f32 %v704_v27, 0.0  ;;  %v705_v31 = vadd.f32 %v1464_v28, %v1833_v58  ;;  %v712_v32 = vmax.f32 %v680_v24, 0.0 }
 0x105   :  { %v713_v33 = vmax.f32 %v681_v29, 0.0  ;;  %v1393_v34 = vpop.f32.mrb[8].mxu0  ;;  %v737_v36 = vmax.f32 %v705_v31, 0.0  ;;  %v1465_v37 = vpop.f32.mrb[8].mxu1 }
 0x106   :  { %v1394_v35 = vpop.f32.mrb[9].mxu0  ;;  %v1466_v41 = vpop.f32.mrb[9].mxu1 }
 0x107   :  { %v743_v38 = vpack.c.bf16 %v713_v33, %v712_v32  ;;  %v1395_v39 = vadd.f32 %v1394_v35, %v1393_v34  ;;  %v1396_v40 = vpop.f32.mrb[10].mxu0  ;;  %v1467_v43 = vadd.f32 %v1466_v41, %v1465_v37  ;;  %v1468_v44 = vpop.f32.mrb[10].mxu1  ;;  %v1845_v45 = vpack.c.bf16 %v737_v36, %v736_v30 }
 0x108   :  { %v1397_v42 = vpop.f32.mrb[11].mxu0  ;;  %v1469_v48 = vpop.f32.mrb[11].mxu1 }
 0x109   :  { %v682_v46 = vadd.f32 %v1395_v39, %v1833_v58  ;;  %v1398_v47 = vadd.f32 %v1397_v42, %v1396_v40  ;;  %1518 = vmatmul.mubr.bf16.vlgmr.msra.gmra.mrb[16].mxu1 %v743_v38  ;;  %v706_v49 = vadd.f32 %v1467_v43, %v1833_v58  ;;  %v1470_v50 = vadd.f32 %v1469_v48, %v1468_v44 }
 0x10b   :  { %v683_v51 = vadd.f32 %v1398_v47, %v1833_v58  ;;  %v738_v52 = vmax.f32 %v706_v49, 0.0  ;;  %v707_v53 = vadd.f32 %v1470_v50, %v1833_v58  ;;  %v714_v54 = vmax.f32 %v682_v46, 0.0 }
 0x10d   :  { %v715_v55 = vmax.f32 %v683_v51, 0.0  ;;  %v1399_v56 = vpop.f32.mrb[12].mxu0  ;;  %v739_v59 = vmax.f32 %v707_v53, 0.0  ;;  %v1471_v60 = vpop.f32.mrb[12].mxu1 }
 0x10e   :  { %v1400_v57 = vpop.f32.mrb[13].mxu0  ;;  %v1472_v0 = vpop.f32.mrb[13].mxu1 }
 0x10f   :  { %v1401_v61 = vadd.f32 %v1400_v57, %v1399_v56  ;;  %v1402_v62 = vpop.f32.mrb[14].mxu0  ;;  %v744_v63 = vpack.c.bf16 %v715_v55, %v714_v54  ;;  %v1473_v2 = vadd.f32 %v1472_v0, %v1471_v60  ;;  %v1474_v3 = vpop.f32.mrb[14].mxu1  ;;  %v1851_v4 = vpack.c.bf16 %v739_v59, %v738_v52 }
 0x110   :  { %v1403_v1 = vpop.f32.mrb[15].mxu0  ;;  %v1475_v7 = vpop.f32.mrb[15].mxu1 }
 0x111   :  { %v684_v5 = vadd.f32 %v1401_v61, %v1833_v58  ;;  %v1404_v6 = vadd.f32 %v1403_v1, %v1402_v62  ;;  %1521 = vmatprep.mubr.bf16.mxu1 %v744_v63  ;;  %v708_v8 = vadd.f32 %v1473_v2, %v1833_v58  ;;  %v1476_v9 = vadd.f32 %v1475_v7, %v1474_v3 }
 0x113   :  { %v685_v10 = vadd.f32 %v1404_v6, %v1833_v58  ;;  %v740_v11 = vmax.f32 %v708_v8, 0.0  ;;  %v709_v12 = vadd.f32 %v1476_v9, %v1833_v58  ;;  %v716_v13 = vmax.f32 %v684_v5, 0.0 }
 0x115   :  { %v717_v14 = vmax.f32 %v685_v10, 0.0  ;;  %v1405_v15 = vpop.f32.mrb[16].mxu0  ;;  %v741_v17 = vmax.f32 %v709_v12, 0.0 }
 0x116   :  { %v1406_v16 = vpop.f32.mrb[17].mxu0 }
 0x117   :  { %v1407_v18 = vadd.f32 %v1406_v16, %v1405_v15  ;;  %v1408_v19 = vpop.f32.mrb[18].mxu0  ;;  %v745_v20 = vpack.c.bf16 %v717_v14, %v716_v13  ;;  %v1857_v22 = vpack.c.bf16 %v741_v17, %v740_v11 }
 0x118   :  { %v1409_v21 = vpop.f32.mrb[19].mxu0 }
 0x119   :  { %v686_v24 = vadd.f32 %v1407_v18, %v1833_v58  ;;  %v1410_v25 = vadd.f32 %v1409_v21, %v1408_v19  ;;  %1522 = vmatmul.mubr.bf16.gmra.mrb[20].mxu1 %v745_v20 }
 0x11b   :  { %v687_v26 = vadd.f32 %v1410_v25, %v1833_v58  ;;  %v718_v27 = vmax.f32 %v686_v24, 0.0 }
 0x11d   :  { %v719_v28 = vmax.f32 %v687_v26, 0.0  ;;  %v1411_v29 = vpop.f32.mrb[20].mxu0 }
 0x11e   :  { %v1412_v30 = vpop.f32.mrb[21].mxu0 }
 0x11f   :  { %v1413_v31 = vadd.f32 %v1412_v30, %v1411_v29  ;;  %v1414_v32 = vpop.f32.mrb[22].mxu0  ;;  %v746_v33 = vpack.c.bf16 %v719_v28, %v718_v27 }
 0x120   :  { %v1415_v34 = vpop.f32.mrb[23].mxu0 }
 0x121   :  { %v688_v35 = vadd.f32 %v1413_v31, %v1833_v58  ;;  %v1416_v36 = vadd.f32 %v1415_v34, %v1414_v32  ;;  %1525 = vmatprep.mubr.bf16.mxu1 %v746_v33 }
 0x123   :  { %v689_v37 = vadd.f32 %v1416_v36, %v1833_v58  ;;  %v720_v38 = vmax.f32 %v688_v35, 0.0 }
 0x125   :  { %v721_v39 = vmax.f32 %v689_v37, 0.0  ;;  %v1417_v40 = vpop.f32.mrb[24].mxu0 }
 0x126   :  { %v1418_v41 = vpop.f32.mrb[25].mxu0 }
 0x127   :  { %v1419_v42 = vadd.f32 %v1418_v41, %v1417_v40  ;;  %v1420_v43 = vpop.f32.mrb[26].mxu0  ;;  %v747_v44 = vpack.c.bf16 %v721_v39, %v720_v38 }
 0x128   :  { %v1421_v46 = vpop.f32.mrb[27].mxu0 }
 0x129   :  { %v690_v47 = vadd.f32 %v1419_v42, %v1833_v58  ;;  %v1422_v48 = vadd.f32 %v1421_v46, %v1420_v43  ;;  %1526 = vmatmul.mubr.bf16.gmra.mrb[24].mxu1 %v747_v44 }
 0x12b   :  { %v691_v49 = vadd.f32 %v1422_v48, %v1833_v58  ;;  %v722_v50 = vmax.f32 %v690_v47, 0.0 }
 0x12d   :  { %v723_v51 = vmax.f32 %v691_v49, 0.0  ;;  %v1423_v52 = vpop.f32.mrb[28].mxu0 }
 0x12e   :  { %v1424_v53 = vpop.f32.mrb[29].mxu0 }
 0x12f   :  { %v1425_v54 = vadd.f32 %v1424_v53, %v1423_v52  ;;  %v1426_v55 = vpop.f32.mrb[30].mxu0  ;;  %v748_v56 = vpack.c.bf16 %v723_v51, %v722_v50 }
 0x130   :  { %v1427_v57 = vpop.f32.mrb[31].mxu0 }
 0x131   :  { %v692_v59 = vadd.f32 %v1425_v54, %v1833_v58  ;;  %v1428_v60 = vadd.f32 %v1427_v57, %v1426_v55  ;;  %1529 = vmatprep.mubr.bf16.mxu1 %v748_v56 }
 0x133   :  { %v693_v61 = vadd.f32 %v1428_v60, %v1833_v58  ;;  %v724_v62 = vmax.f32 %v692_v59, 0.0 }
 0x135   :  { %v725_v63 = vmax.f32 %v693_v61, 0.0  ;;  %v1429_v0 = vpop.f32.mrb[32].mxu0 }
 0x136   :  { %v1430_v1 = vpop.f32.mrb[33].mxu0 }
 0x137   :  { %v1431_v2 = vadd.f32 %v1430_v1, %v1429_v0  ;;  %v1432_v3 = vpop.f32.mrb[34].mxu0  ;;  %v749_v5 = vpack.c.bf16 %v725_v63, %v724_v62 }
 0x138   :  { %v1433_v6 = vpop.f32.mrb[35].mxu0 }
 0x139   :  { %v694_v7 = vadd.f32 %v1431_v2, %v1833_v58  ;;  %v1434_v8 = vadd.f32 %v1433_v6, %v1432_v3  ;;  %1530 = vmatmul.mubr.bf16.gmra.mrb[28].mxu1 %v749_v5 }
 0x13b   :  { %v695_v9 = vadd.f32 %v1434_v8, %v1833_v58  ;;  %v726_v10 = vmax.f32 %v694_v7, 0.0 }
 0x13d   :  { %v727_v11 = vmax.f32 %v695_v9, 0.0  ;;  %v1435_v12 = vpop.f32.mrb[36].mxu0 }
 0x13e   :  { %v1436_v13 = vpop.f32.mrb[37].mxu0 }
 0x13f   :  { %v1437_v14 = vadd.f32 %v1436_v13, %v1435_v12  ;;  %v1438_v15 = vpop.f32.mrb[38].mxu0  ;;  %v750_v16 = vpack.c.bf16 %v727_v11, %v726_v10 }
 0x140   :  { %v1439_v17 = vpop.f32.mrb[39].mxu0 }
 0x141   :  { %v696_v18 = vadd.f32 %v1437_v14, %v1833_v58  ;;  %v1440_v19 = vadd.f32 %v1439_v17, %v1438_v15  ;;  %1533 = vmatprep.mubr.bf16.mxu1 %v750_v16 }
 0x143   :  { %v697_v20 = vadd.f32 %v1440_v19, %v1833_v58  ;;  %v728_v21 = vmax.f32 %v696_v18, 0.0 }
 0x145   :  { %v729_v24 = vmax.f32 %v697_v20, 0.0  ;;  %v1441_v25 = vpop.f32.mrb[40].mxu0 }
 0x146   :  { %v1442_v26 = vpop.f32.mrb[41].mxu0 }
 0x147   :  { %v1443_v27 = vadd.f32 %v1442_v26, %v1441_v25  ;;  %v1444_v28 = vpop.f32.mrb[42].mxu0  ;;  %v751_v29 = vpack.c.bf16 %v729_v24, %v728_v21 }
 0x148   :  { %v1445_v30 = vpop.f32.mrb[43].mxu0 }
 0x149   :  { %v698_v31 = vadd.f32 %v1443_v27, %v1833_v58  ;;  %v1446_v32 = vadd.f32 %v1445_v30, %v1444_v28  ;;  %1534 = vmatmul.mubr.bf16.gmra.mrb[32].mxu1 %v751_v29 }
 0x14b   :  { %v699_v33 = vadd.f32 %v1446_v32, %v1833_v58  ;;  %v730_v34 = vmax.f32 %v698_v31, 0.0 }
 0x14d   :  { %v731_v35 = vmax.f32 %v699_v33, 0.0  ;;  %v1447_v36 = vpop.f32.mrb[44].mxu0 }
 0x14e   :  { %v1448_v37 = vpop.f32.mrb[45].mxu0 }
 0x14f   :  { %v1449_v38 = vadd.f32 %v1448_v37, %v1447_v36  ;;  %v1450_v39 = vpop.f32.mrb[46].mxu0  ;;  %v752_v40 = vpack.c.bf16 %v731_v35, %v730_v34 }
 0x150   :  { %v1451_v41 = vpop.f32.mrb[47].mxu0 }
 0x151   :  { %v700_v42 = vadd.f32 %v1449_v38, %v1833_v58  ;;  %v1452_v43 = vadd.f32 %v1451_v41, %v1450_v39  ;;  %1537 = vmatprep.mubr.bf16.mxu1 %v752_v40 }
 0x153   :  { %v701_v44 = vadd.f32 %v1452_v43, %v1833_v58  ;;  %v732_v46 = vmax.f32 %v700_v42, 0.0 }
 0x155   :  { %v733_v47 = vmax.f32 %v701_v44, 0.0 }
 0x157   :  { %v753_v48 = vpack.c.bf16 %v733_v47, %v732_v46 }
 0x159   :  { %1538 = vmatmul.mubr.bf16.gmra.mrb[36].mxu1 %v753_v48 }
 0x15a   :  { %1541 = vmatprep.mubr.bf16.mxu1 %v1839_v23 }
 0x161   :  { %1542 = vmatmul.mubr.bf16.gmra.mrb[40].mxu1 %v1845_v45 }
 0x162   :  { %1545 = vmatprep.mubr.bf16.mxu1 %v1851_v4 }
 0x169   :  { %1546 = vmatmul.mubr.bf16.gmra.mrb[44].mxu1 %v1857_v22 }
 0x1dc   :  { %v1519_v49 = vpop.f32.mrb[16].mxu1 }
 0x1dd   :  { %v856_v50 = vpop.f32.mrb[17].mxu1 }
 0x1de   :  { %v1520_v51 = vpop.f32.mrb[18].mxu1 }
 0x1df   :  { %v1278_v52 = vpack.c.bf16 %v1520_v51, %v1519_v49  ;;  %v859_v53 = vpop.f32.mrb[19].mxu1 }
 0x1e0   :  { %v1273_v54 = vpack.c.bf16 %v859_v53, %v856_v50 }
 0x1e1   :  { %1350 = vst [vmem:[%s1931_s4 + $0x8] sm:$0xff] %v1278_v52  }
 0x1e2   :  { %1274 = vst [vmem:[%s1931_s4] sm:$0xff] %v1273_v54  }
 0x1ec   :  { %v1523_v58 = vpop.f32.mrb[20].mxu1 }
 0x1ed   :  { %v872_v23 = vpop.f32.mrb[21].mxu1 }
 0x1ee   :  { %v1524_v45 = vpop.f32.mrb[22].mxu1 }
 0x1ef   :  { %v1288_v4 = vpack.c.bf16 %v1524_v45, %v1523_v58  ;;  %v875_v55 = vpop.f32.mrb[23].mxu1 }
 0x1f0   :  { %v1283_v22 = vpack.c.bf16 %v875_v55, %v872_v23 }
 0x1f1   :  { %1352 = vst [vmem:[%s1931_s4 + $0x18] sm:$0xff] %v1288_v4  }
 0x1f2   :  { %1351 = vst [vmem:[%s1931_s4 + $0x10] sm:$0xff] %v1283_v22  }
 0x1fc   :  { %v1527_v56 = vpop.f32.mrb[24].mxu1 }
 0x1fd   :  { %v888_v57 = vpop.f32.mrb[25].mxu1 }
 0x1fe   :  { %v1528_v59 = vpop.f32.mrb[26].mxu1 }
 0x1ff   :  { %v1298_v60 = vpack.c.bf16 %v1528_v59, %v1527_v56  ;;  %v891_v61 = vpop.f32.mrb[27].mxu1 }
 0x200   :  { %v1293_v62 = vpack.c.bf16 %v891_v61, %v888_v57 }
 0x201   :  { %1354 = vst [vmem:[%s1931_s4 + $0x28] sm:$0xff] %v1298_v60  }
 0x202   :  { %1353 = vst [vmem:[%s1931_s4 + $0x20] sm:$0xff] %v1293_v62  }
 0x20c   :  { %v1531_v63 = vpop.f32.mrb[28].mxu1 }
 0x20d   :  { %v904_v0 = vpop.f32.mrb[29].mxu1 }
 0x20e   :  { %v1532_v1 = vpop.f32.mrb[30].mxu1 }
 0x20f   :  { %v1308_v2 = vpack.c.bf16 %v1532_v1, %v1531_v63  ;;  %v907_v3 = vpop.f32.mrb[31].mxu1 }
 0x210   :  { %v1303_v5 = vpack.c.bf16 %v907_v3, %v904_v0 }
 0x211   :  { %1356 = vst [vmem:[%s1931_s4 + $0x38] sm:$0xff] %v1308_v2  }
 0x212   :  { %1355 = vst [vmem:[%s1931_s4 + $0x30] sm:$0xff] %v1303_v5  }
 0x21c   :  { %v1535_v6 = vpop.f32.mrb[32].mxu1 }
 0x21d   :  { %v920_v7 = vpop.f32.mrb[33].mxu1 }
 0x21e   :  { %v1536_v8 = vpop.f32.mrb[34].mxu1 }
 0x21f   :  { %v1318_v9 = vpack.c.bf16 %v1536_v8, %v1535_v6  ;;  %v923_v10 = vpop.f32.mrb[35].mxu1 }
 0x220   :  { %v1313_v11 = vpack.c.bf16 %v923_v10, %v920_v7 }
 0x221   :  { %1358 = vst [vmem:[%s1931_s4 + $0x48] sm:$0xff] %v1318_v9  }
 0x222   :  { %1357 = vst [vmem:[%s1931_s4 + $0x40] sm:$0xff] %v1313_v11  }
 0x22c   :  { %v1539_v12 = vpop.f32.mrb[36].mxu1 }
 0x22d   :  { %v936_v13 = vpop.f32.mrb[37].mxu1 }
 0x22e   :  { %v1540_v14 = vpop.f32.mrb[38].mxu1 }
 0x22f   :  { %v1328_v15 = vpack.c.bf16 %v1540_v14, %v1539_v12  ;;  %v939_v16 = vpop.f32.mrb[39].mxu1 }
 0x230   :  { %v1323_v17 = vpack.c.bf16 %v939_v16, %v936_v13 }
 0x231   :  { %1360 = vst [vmem:[%s1931_s4 + $0x58] sm:$0xff] %v1328_v15  }
 0x232   :  { %1359 = vst [vmem:[%s1931_s4 + $0x50] sm:$0xff] %v1323_v17  }
 0x234   :  { %v1543_v18 = vpop.f32.mrb[40].mxu1 }
 0x235   :  { %v952_v19 = vpop.f32.mrb[41].mxu1 }
 0x236   :  { %v1544_v20 = vpop.f32.mrb[42].mxu1 }
 0x237   :  { %v1338_v21 = vpack.c.bf16 %v1544_v20, %v1543_v18  ;;  %v955_v24 = vpop.f32.mrb[43].mxu1 }
 0x238   :  { %v1333_v25 = vpack.c.bf16 %v955_v24, %v952_v19 }
 0x239   :  { %1362 = vst [vmem:[%s1931_s4 + $0x68] sm:$0xff] %v1338_v21  }
 0x23a   :  { %1361 = vst [vmem:[%s1931_s4 + $0x60] sm:$0xff] %v1333_v25  }
 0x23c   :  { %v1547_v26 = vpop.f32.mrb[44].mxu1 }
 0x23d   :  { %v968_v27 = vpop.f32.mrb[45].mxu1 }
 0x23e   :  { %v1548_v28 = vpop.f32.mrb[46].mxu1 }
 0x23f   :  { %v1348_v29 = vpack.c.bf16 %v1548_v28, %v1547_v26  ;;  %v971_v30 = vpop.f32.mrb[47].mxu1 }
 0x240   :  { %v1343_v31 = vpack.c.bf16 %v971_v30, %v968_v27 }
 0x241   :  { %1364 = vst [vmem:[%s1931_s4 + $0x78] sm:$0xff] %v1348_v29  }
 0x242   :  { %1363 = vst [vmem:[%s1931_s4 + $0x70] sm:$0xff] %v1343_v31  }

// kernel: _smgnn_forward.5
= control target key start
LH: loop header
LB: loop body
LE: loop exit
PB: predicated region body
PF: predicated region fallthrough
CT: control target
= control target key end

     0   :  { %s2445_s1 = inlined_call_operand.vmem [shape: bf16[256,128], index: 1, kind: input, shape index: {}]   ;;  %s2446_s0 = inlined_call_operand.vmem [shape: bf16[256,256], index: 0, kind: input, shape index: {}]   ;;  %s2447_s3 = inlined_call_operand.vmem [shape: bf16[128,128], index: 3, kind: input, shape index: {}]   ;;  %s2448_s2 = inlined_call_operand.vmem [shape: f32[1,128], index: 2, kind: input, shape index: {}]   ;;  %s2449_s4 = inlined_call_operand.vmem [shape: f32[1,128], index: 4, kind: input, shape index: {}]   ;;  %s2450_s5 = inlined_call_operand.vmem [shape: f32[256,128], index: 5, kind: output, shape index: {}]  }
   0x1   :  { %v1609_v0 = vld [vmem:[%s2445_s1 + $0x40] sm:$0xff]   ;;  %v1611_v2 = vld [vmem:[%s2445_s1 + $0x48] sm:$0xff]   ;;  %v1613_v4 = vld [vmem:[%s2445_s1 + $0x50] sm:$0xff]  }
   0x2   :  { %v1610_v1 = vld [vmem:[%s2445_s1] sm:$0xff]   ;;  %1409 = vmatprep.subr.bf16.mxu0 %v1609_v0  ;;  %1593 = vmatprep.subr.bf16.mxu1 %v1609_v0  ;;  %v1612_v3 = vld [vmem:[%s2445_s1 + $0x8] sm:$0xff]   ;;  %v1614_v5 = vld [vmem:[%s2445_s1 + $0x10] sm:$0xff]  }
   0x3   :  { %1410 = vmatpush3.bf16.msra.mxu0 %v1610_v1  ;;  %1601 = vmatpush3.bf16.msra.mxu1 %v1610_v1  ;;  %v1615_v6 = vld [vmem:[%s2445_s1 + $0x58] sm:$0xff]   ;;  %v1617_v8 = vld [vmem:[%s2445_s1 + $0x60] sm:$0xff]   ;;  %v1619_v10 = vld [vmem:[%s2445_s1 + $0x68] sm:$0xff]  }
   0x4   :  { %1411 = vmatprep.subr.bf16.mxu0 %v1611_v2  ;;  %1594 = vmatprep.subr.bf16.mxu1 %v1611_v2  ;;  %v1616_v7 = vld [vmem:[%s2445_s1 + $0x18] sm:$0xff]   ;;  %v1618_v9 = vld [vmem:[%s2445_s1 + $0x20] sm:$0xff]   ;;  %v1620_v12 = vld [vmem:[%s2445_s1 + $0x28] sm:$0xff]  }
   0x5   :  { %v1627_v11 = vld [vmem:[%s2446_s0 + $0x4] ss:$8 sps:$4 sm:$0xff]   ;;  %v1621_v13 = vld [vmem:[%s2445_s1 + $0x70] sm:$0xff]   ;;  %v1623_v15 = vld [vmem:[%s2445_s1 + $0x78] sm:$0xff]  }
   0x6   :  { %446 = vmatprep.mubr.bf16.mxu0 %v1627_v11  ;;  %v1622_v14 = vld [vmem:[%s2445_s1 + $0x30] sm:$0xff]   ;;  %v1624_v16 = vld [vmem:[%s2445_s1 + $0x38] sm:$0xff]   ;;  %v1625_v17 = vld [vmem:[%s2446_s0] ss:$8 sps:$4 sm:$0xff]  }
   0x7   :  { %1412 = vmatpush3.bf16.msra.mxu0 %v1612_v3  ;;  %1602 = vmatpush3.bf16.msra.mxu1 %v1612_v3  ;;  %v1657_v18 = vld [vmem:[%s2446_s0 + $0xc4] ss:$8 sps:$4 sm:$0xff]   ;;  %v1628_v19 = vld [vmem:[%s2446_s0 + $0x14] ss:$8 sps:$4 sm:$0xff]   ;;  %v1655_v20 = vld [vmem:[%s2446_s0 + $0xc0] ss:$8 sps:$4 sm:$0xff]  }
   0x8   :  { %1413 = vmatprep.subr.bf16.mxu0 %v1613_v4  ;;  %1595 = vmatprep.subr.bf16.mxu1 %v1613_v4  ;;  %v1661_v21 = vld [vmem:[%s2446_s0 + $0xd4] ss:$8 sps:$4 sm:$0xff]   ;;  %v1630_v22 = vld [vmem:[%s2446_s0 + $0x10] ss:$8 sps:$4 sm:$0xff]   ;;  %v1631_v23 = vld [vmem:[%s2446_s0 + $0x24] ss:$8 sps:$4 sm:$0xff]  }
   0x9   :  { %542 = vmatprep.mubr.bf16.mxu1 %v1657_v18  ;;  %v1663_v24 = vld [vmem:[%s2446_s0 + $0xd0] ss:$8 sps:$4 sm:$0xff]   ;;  %v1667_v25 = vld [vmem:[%s2446_s0 + $0xe4] ss:$8 sps:$4 sm:$0xff]   ;;  %v1633_v29 = vld [vmem:[%s2446_s0 + $0x20] ss:$8 sps:$4 sm:$0xff]  }
   0xa   :  { %v1673_v26 = vld [vmem:[%s2447_s3] sm:$0xff]   ;;  %v1674_v27 = vld [vmem:[%s2447_s3 + $0x8] sm:$0xff]   ;;  %v1675_v28 = vld [vmem:[%s2447_s3 + $0x10] sm:$0xff]  }
   0xb   :  { %1414 = vmatpush3.bf16.msra.mxu0 %v1614_v5  ;;  %1603 = vmatpush3.bf16.msra.mxu1 %v1614_v5  ;;  %v1634_v30 = vld [vmem:[%s2446_s0 + $0x34] ss:$8 sps:$4 sm:$0xff]   ;;  %v1669_v31 = vld [vmem:[%s2446_s0 + $0xe0] ss:$8 sps:$4 sm:$0xff]   ;;  %v1636_v33 = vld [vmem:[%s2446_s0 + $0x30] ss:$8 sps:$4 sm:$0xff]  }
   0xc   :  { %1415 = vmatprep.subr.bf16.mxu0 %v1615_v6  ;;  %1596 = vmatprep.subr.bf16.mxu1 %v1615_v6  ;;  %v1670_v32 = vld [vmem:[%s2446_s0 + $0xf4] ss:$8 sps:$4 sm:$0xff]   ;;  %v1637_v34 = vld [vmem:[%s2446_s0 + $0x44] ss:$8 sps:$4 sm:$0xff]   ;;  %v1672_v35 = vld [vmem:[%s2446_s0 + $0xf0] ss:$8 sps:$4 sm:$0xff]  }
   0xd   :  { %v1639_v36 = vld [vmem:[%s2446_s0 + $0x40] ss:$8 sps:$4 sm:$0xff]   ;;  %v1640_v37 = vld [vmem:[%s2446_s0 + $0x54] ss:$8 sps:$4 sm:$0xff]   ;;  %v1642_v38 = vld [vmem:[%s2446_s0 + $0x50] ss:$8 sps:$4 sm:$0xff]  }
   0xe   :  { %v1643_v39 = vld [vmem:[%s2446_s0 + $0x64] ss:$8 sps:$4 sm:$0xff]   ;;  %v1645_v40 = vld [vmem:[%s2446_s0 + $0x60] ss:$8 sps:$4 sm:$0xff]   ;;  %v1646_v41 = vld [vmem:[%s2446_s0 + $0x74] ss:$8 sps:$4 sm:$0xff]  }
   0xf   :  { %1416 = vmatpush3.bf16.msra.mxu0 %v1616_v7  ;;  %1604 = vmatpush3.bf16.msra.mxu1 %v1616_v7  ;;  %v1648_v42 = vld [vmem:[%s2446_s0 + $0x70] ss:$8 sps:$4 sm:$0xff]   ;;  %v1649_v43 = vld [vmem:[%s2446_s0 + $0x84] ss:$8 sps:$4 sm:$0xff]   ;;  %v1651_v44 = vld [vmem:[%s2446_s0 + $0x80] ss:$8 sps:$4 sm:$0xff]  }
  0x10   :  { %1417 = vmatprep.subr.bf16.mxu0 %v1617_v8  ;;  %1597 = vmatprep.subr.bf16.mxu1 %v1617_v8  ;;  %v1652_v45 = vld [vmem:[%s2446_s0 + $0x94] ss:$8 sps:$4 sm:$0xff]   ;;  %v1654_v46 = vld [vmem:[%s2446_s0 + $0x90] ss:$8 sps:$4 sm:$0xff]   ;;  %v1658_v47 = vld [vmem:[%s2446_s0 + $0xa4] ss:$8 sps:$4 sm:$0xff]  }
  0x11   :  { %v1660_v48 = vld [vmem:[%s2446_s0 + $0xa0] ss:$8 sps:$4 sm:$0xff]   ;;  %v1664_v49 = vld [vmem:[%s2446_s0 + $0xb4] ss:$8 sps:$4 sm:$0xff]   ;;  %v1666_v51 = vld [vmem:[%s2446_s0 + $0xb0] ss:$8 sps:$4 sm:$0xff]  }
  0x12   :  { %v1676_v50 = vld [vmem:[%s2447_s3 + $0x18] sm:$0xff]   ;;  %v1677_v52 = vld [vmem:[%s2447_s3 + $0x20] sm:$0xff]   ;;  %v1678_v53 = vld [vmem:[%s2447_s3 + $0x28] sm:$0xff]  }
  0x13   :  { %1418 = vmatpush3.bf16.msra.mxu0 %v1618_v9  ;;  %1605 = vmatpush3.bf16.msra.mxu1 %v1618_v9  ;;  %v1679_v54 = vld [vmem:[%s2447_s3 + $0x30] sm:$0xff]   ;;  %v1680_v55 = vld [vmem:[%s2447_s3 + $0x38] sm:$0xff]   ;;  %v2010_v58 = vld [vmem:[%s2448_s2] ss:$0 sm:$0xff] }
  0x14   :  { %1419 = vmatprep.subr.bf16.mxu0 %v1619_v10  ;;  %1598 = vmatprep.subr.bf16.mxu1 %v1619_v10 }
  0x17   :  { %1420 = vmatpush3.bf16.msra.mxu0 %v1620_v12  ;;  %1606 = vmatpush3.bf16.msra.mxu1 %v1620_v12 }
  0x18   :  { %1421 = vmatprep.subr.bf16.mxu0 %v1621_v13  ;;  %1599 = vmatprep.subr.bf16.mxu1 %v1621_v13 }
  0x1b   :  { %1422 = vmatpush3.bf16.msra.mxu0 %v1622_v14  ;;  %1607 = vmatpush3.bf16.msra.mxu1 %v1622_v14 }
  0x1c   :  { %1423 = vmatprep.subr.bf16.mxu0 %v1623_v15  ;;  %1600 = vmatprep.subr.bf16.mxu1 %v1623_v15 }
  0x1f   :  { %1424 = vmatpush3.bf16.msra.mxu0 %v1624_v16  ;;  %1608 = vmatpush3.bf16.msra.mxu1 %v1624_v16 }
  0x20   :  { %1545 = vmatprep.subr.bf16.mxu1 %v1673_v26 }
  0x22   :  { %447 = vmatmul.mubr.bf16.vlgmr.msra.gmra.mrb[0].mxu0 %v1625_v17  ;;  %543 = vmatmul.mubr.bf16.vlgmr.msra.gmra.mrb[0].mxu1 %v1655_v20 }
  0x23   :  { %454 = vmatprep.mubr.bf16.mxu0 %v1628_v19  ;;  %550 = vmatprep.mubr.bf16.mxu1 %v1661_v21 }
  0x24   :  { %1546 = vmatpush3.bf16.msra.mxu1 %v1673_v26 }
  0x25   :  { %1547 = vmatprep.subr.bf16.mxu1 %v1674_v27 }
  0x28   :  { %1548 = vmatpush3.bf16.msra.mxu1 %v1674_v27 }
  0x29   :  { %1549 = vmatprep.subr.bf16.mxu1 %v1675_v28 }
  0x2a   :  { %455 = vmatmul.mubr.bf16.gmra.mrb[4].mxu0 %v1630_v22  ;;  %551 = vmatmul.mubr.bf16.gmra.mrb[4].mxu1 %v1663_v24 }
  0x2b   :  { %462 = vmatprep.mubr.bf16.mxu0 %v1631_v23  ;;  %558 = vmatprep.mubr.bf16.mxu1 %v1667_v25 }
  0x2c   :  { %1550 = vmatpush3.bf16.msra.mxu1 %v1675_v28 }
  0x2d   :  { %1551 = vmatprep.subr.bf16.mxu1 %v1676_v50 }
  0x30   :  { %1552 = vmatpush3.bf16.msra.mxu1 %v1676_v50 }
  0x31   :  { %1553 = vmatprep.subr.bf16.mxu1 %v1677_v52 }
  0x32   :  { %463 = vmatmul.mubr.bf16.gmra.mrb[8].mxu0 %v1633_v29  ;;  %559 = vmatmul.mubr.bf16.gmra.mrb[8].mxu1 %v1669_v31 }
  0x33   :  { %470 = vmatprep.mubr.bf16.mxu0 %v1634_v30  ;;  %566 = vmatprep.mubr.bf16.mxu1 %v1670_v32 }
  0x34   :  { %1554 = vmatpush3.bf16.msra.mxu1 %v1677_v52 }
  0x35   :  { %1555 = vmatprep.subr.bf16.mxu1 %v1678_v53 }
  0x38   :  { %1556 = vmatpush3.bf16.msra.mxu1 %v1678_v53 }
  0x39   :  { %1557 = vmatprep.subr.bf16.mxu1 %v1679_v54 }
  0x3a   :  { %471 = vmatmul.mubr.bf16.gmra.mrb[12].mxu0 %v1636_v33  ;;  %567 = vmatmul.mubr.bf16.gmra.mrb[12].mxu1 %v1672_v35 }
  0x3b   :  { %478 = vmatprep.mubr.bf16.mxu0 %v1637_v34 }
  0x3c   :  { %1558 = vmatpush3.bf16.msra.mxu1 %v1679_v54 }
  0x3d   :  { %1559 = vmatprep.subr.bf16.mxu1 %v1680_v55 }
  0x40   :  { %1560 = vmatpush3.bf16.msra.mxu1 %v1680_v55 }
  0x42   :  { %479 = vmatmul.mubr.bf16.gmra.mrb[16].mxu0 %v1639_v36 }
  0x43   :  { %486 = vmatprep.mubr.bf16.mxu0 %v1640_v37 }
  0x4a   :  { %487 = vmatmul.mubr.bf16.gmra.mrb[20].mxu0 %v1642_v38 }
  0x4b   :  { %494 = vmatprep.mubr.bf16.mxu0 %v1643_v39 }
  0x52   :  { %495 = vmatmul.mubr.bf16.gmra.mrb[24].mxu0 %v1645_v40 }
  0x53   :  { %502 = vmatprep.mubr.bf16.mxu0 %v1646_v41 }
  0x5a   :  { %503 = vmatmul.mubr.bf16.gmra.mrb[28].mxu0 %v1648_v42 }
  0x5b   :  { %510 = vmatprep.mubr.bf16.mxu0 %v1649_v43 }
  0x62   :  { %511 = vmatmul.mubr.bf16.gmra.mrb[32].mxu0 %v1651_v44 }
  0x63   :  { %518 = vmatprep.mubr.bf16.mxu0 %v1652_v45 }
  0x6a   :  { %519 = vmatmul.mubr.bf16.gmra.mrb[36].mxu0 %v1654_v46 }
  0x6b   :  { %526 = vmatprep.mubr.bf16.mxu0 %v1658_v47 }
  0x72   :  { %527 = vmatmul.mubr.bf16.gmra.mrb[40].mxu0 %v1660_v48 }
  0x73   :  { %534 = vmatprep.mubr.bf16.mxu0 %v1664_v49 }
  0x7a   :  { %535 = vmatmul.mubr.bf16.gmra.mrb[44].mxu0 %v1666_v51 }
  0xf5   :  { %v1425_v56 = vpop.f32.mrb[0].mxu0  ;;  %v1497_v59 = vpop.f32.mrb[0].mxu1 }
  0xf6   :  { %v1426_v57 = vpop.f32.mrb[1].mxu0  ;;  %v1498_v62 = vpop.f32.mrb[1].mxu1 }
  0xf7   :  { %v1427_v60 = vadd.f32 %v1426_v57, %v1425_v56  ;;  %v1428_v61 = vpop.f32.mrb[2].mxu0  ;;  %v1499_v0 = vadd.f32 %v1498_v62, %v1497_v59  ;;  %v1500_v1 = vpop.f32.mrb[2].mxu1 }
  0xf8   :  { %v1429_v63 = vpop.f32.mrb[3].mxu0  ;;  %v1501_v4 = vpop.f32.mrb[3].mxu1 }
  0xf9   :  { %v681_v2 = vadd.f32 %v1427_v60, %v2010_v58  ;;  %v1430_v3 = vadd.f32 %v1429_v63, %v1428_v61  ;;  %v705_v5 = vadd.f32 %v1499_v0, %v2010_v58  ;;  %v1502_v6 = vadd.f32 %v1501_v4, %v1500_v1 }
  0xfb   :  { %v682_v7 = vadd.f32 %v1430_v3, %v2010_v58  ;;  %v737_v8 = vmax.f32 %v705_v5, 0.0  ;;  %v706_v9 = vadd.f32 %v1502_v6, %v2010_v58  ;;  %v713_v10 = vmax.f32 %v681_v2, 0.0 }
  0xfd   :  { %v714_v11 = vmax.f32 %v682_v7, 0.0  ;;  %v1431_v12 = vpop.f32.mrb[4].mxu0  ;;  %v738_v14 = vmax.f32 %v706_v9, 0.0  ;;  %v1503_v15 = vpop.f32.mrb[4].mxu1 }
  0xfe   :  { %v1432_v13 = vpop.f32.mrb[5].mxu0  ;;  %v1504_v19 = vpop.f32.mrb[5].mxu1 }
  0xff   :  { %v1433_v16 = vadd.f32 %v1432_v13, %v1431_v12  ;;  %v1434_v17 = vpop.f32.mrb[6].mxu0  ;;  %v745_v18 = vpack.c.bf16 %v714_v11, %v713_v10  ;;  %v1505_v21 = vadd.f32 %v1504_v19, %v1503_v15  ;;  %v1506_v22 = vpop.f32.mrb[6].mxu1  ;;  %v2016_v23 = vpack.c.bf16 %v738_v14, %v737_v8 }
 0x100   :  { %v1435_v20 = vpop.f32.mrb[7].mxu0  ;;  %v1507_v26 = vpop.f32.mrb[7].mxu1 }
 0x101   :  { %v683_v24 = vadd.f32 %v1433_v16, %v2010_v58  ;;  %v1436_v25 = vadd.f32 %v1435_v20, %v1434_v17  ;;  %1561 = vmatprep.mubr.bf16.mxu1 %v745_v18  ;;  %v707_v27 = vadd.f32 %v1505_v21, %v2010_v58  ;;  %v1508_v28 = vadd.f32 %v1507_v26, %v1506_v22 }
 0x103   :  { %v684_v29 = vadd.f32 %v1436_v25, %v2010_v58  ;;  %v739_v30 = vmax.f32 %v707_v27, 0.0  ;;  %v708_v31 = vadd.f32 %v1508_v28, %v2010_v58  ;;  %v715_v32 = vmax.f32 %v683_v24, 0.0 }
 0x105   :  { %v716_v33 = vmax.f32 %v684_v29, 0.0  ;;  %v1437_v34 = vpop.f32.mrb[8].mxu0  ;;  %v740_v36 = vmax.f32 %v708_v31, 0.0  ;;  %v1509_v37 = vpop.f32.mrb[8].mxu1 }
 0x106   :  { %v1438_v35 = vpop.f32.mrb[9].mxu0  ;;  %v1510_v41 = vpop.f32.mrb[9].mxu1 }
 0x107   :  { %v746_v38 = vpack.c.bf16 %v716_v33, %v715_v32  ;;  %v1439_v39 = vadd.f32 %v1438_v35, %v1437_v34  ;;  %v1440_v40 = vpop.f32.mrb[10].mxu0  ;;  %v1511_v43 = vadd.f32 %v1510_v41, %v1509_v37  ;;  %v1512_v44 = vpop.f32.mrb[10].mxu1  ;;  %v2022_v45 = vpack.c.bf16 %v740_v36, %v739_v30 }
 0x108   :  { %v1441_v42 = vpop.f32.mrb[11].mxu0  ;;  %v1513_v48 = vpop.f32.mrb[11].mxu1 }
 0x109   :  { %v685_v46 = vadd.f32 %v1439_v39, %v2010_v58  ;;  %v1442_v47 = vadd.f32 %v1441_v42, %v1440_v40  ;;  %1562 = vmatmul.mubr.bf16.vlgmr.msra.gmra.mrb[16].mxu1 %v746_v38  ;;  %v709_v49 = vadd.f32 %v1511_v43, %v2010_v58  ;;  %v1514_v50 = vadd.f32 %v1513_v48, %v1512_v44 }
 0x10b   :  { %v686_v51 = vadd.f32 %v1442_v47, %v2010_v58  ;;  %v741_v52 = vmax.f32 %v709_v49, 0.0  ;;  %v710_v53 = vadd.f32 %v1514_v50, %v2010_v58  ;;  %v717_v54 = vmax.f32 %v685_v46, 0.0 }
 0x10d   :  { %v718_v55 = vmax.f32 %v686_v51, 0.0  ;;  %v1443_v56 = vpop.f32.mrb[12].mxu0  ;;  %v742_v59 = vmax.f32 %v710_v53, 0.0  ;;  %v1515_v60 = vpop.f32.mrb[12].mxu1 }
 0x10e   :  { %v1444_v57 = vpop.f32.mrb[13].mxu0  ;;  %v1516_v0 = vpop.f32.mrb[13].mxu1 }
 0x10f   :  { %v1445_v61 = vadd.f32 %v1444_v57, %v1443_v56  ;;  %v1446_v62 = vpop.f32.mrb[14].mxu0  ;;  %v747_v63 = vpack.c.bf16 %v718_v55, %v717_v54  ;;  %v1517_v2 = vadd.f32 %v1516_v0, %v1515_v60  ;;  %v1518_v3 = vpop.f32.mrb[14].mxu1  ;;  %v2028_v4 = vpack.c.bf16 %v742_v59, %v741_v52 }
 0x110   :  { %v1447_v1 = vpop.f32.mrb[15].mxu0  ;;  %v1519_v7 = vpop.f32.mrb[15].mxu1 }
 0x111   :  { %v687_v5 = vadd.f32 %v1445_v61, %v2010_v58  ;;  %v1448_v6 = vadd.f32 %v1447_v1, %v1446_v62  ;;  %1565 = vmatprep.mubr.bf16.mxu1 %v747_v63  ;;  %v711_v8 = vadd.f32 %v1517_v2, %v2010_v58  ;;  %v1520_v9 = vadd.f32 %v1519_v7, %v1518_v3 }
 0x113   :  { %v688_v10 = vadd.f32 %v1448_v6, %v2010_v58  ;;  %v743_v11 = vmax.f32 %v711_v8, 0.0  ;;  %v712_v12 = vadd.f32 %v1520_v9, %v2010_v58  ;;  %v719_v13 = vmax.f32 %v687_v5, 0.0 }
 0x115   :  { %v720_v14 = vmax.f32 %v688_v10, 0.0  ;;  %v1449_v15 = vpop.f32.mrb[16].mxu0  ;;  %v744_v17 = vmax.f32 %v712_v12, 0.0 }
 0x116   :  { %v1450_v16 = vpop.f32.mrb[17].mxu0 }
 0x117   :  { %v1451_v18 = vadd.f32 %v1450_v16, %v1449_v15  ;;  %v1452_v19 = vpop.f32.mrb[18].mxu0  ;;  %v748_v20 = vpack.c.bf16 %v720_v14, %v719_v13  ;;  %v2034_v22 = vpack.c.bf16 %v744_v17, %v743_v11 }
 0x118   :  { %v1453_v21 = vpop.f32.mrb[19].mxu0 }
 0x119   :  { %v689_v24 = vadd.f32 %v1451_v18, %v2010_v58  ;;  %v1454_v25 = vadd.f32 %v1453_v21, %v1452_v19  ;;  %1566 = vmatmul.mubr.bf16.gmra.mrb[20].mxu1 %v748_v20 }
 0x11b   :  { %v690_v26 = vadd.f32 %v1454_v25, %v2010_v58  ;;  %v721_v27 = vmax.f32 %v689_v24, 0.0 }
 0x11d   :  { %v722_v28 = vmax.f32 %v690_v26, 0.0  ;;  %v1455_v29 = vpop.f32.mrb[20].mxu0 }
 0x11e   :  { %v1456_v30 = vpop.f32.mrb[21].mxu0 }
 0x11f   :  { %v1457_v31 = vadd.f32 %v1456_v30, %v1455_v29  ;;  %v1458_v32 = vpop.f32.mrb[22].mxu0  ;;  %v749_v33 = vpack.c.bf16 %v722_v28, %v721_v27 }
 0x120   :  { %v1459_v34 = vpop.f32.mrb[23].mxu0 }
 0x121   :  { %v691_v35 = vadd.f32 %v1457_v31, %v2010_v58  ;;  %v1460_v36 = vadd.f32 %v1459_v34, %v1458_v32  ;;  %1569 = vmatprep.mubr.bf16.mxu1 %v749_v33 }
 0x123   :  { %v692_v37 = vadd.f32 %v1460_v36, %v2010_v58  ;;  %v723_v38 = vmax.f32 %v691_v35, 0.0 }
 0x125   :  { %v724_v39 = vmax.f32 %v692_v37, 0.0  ;;  %v1461_v40 = vpop.f32.mrb[24].mxu0 }
 0x126   :  { %v1462_v41 = vpop.f32.mrb[25].mxu0 }
 0x127   :  { %v1463_v42 = vadd.f32 %v1462_v41, %v1461_v40  ;;  %v1464_v43 = vpop.f32.mrb[26].mxu0  ;;  %v750_v44 = vpack.c.bf16 %v724_v39, %v723_v38 }
 0x128   :  { %v1465_v46 = vpop.f32.mrb[27].mxu0 }
 0x129   :  { %v693_v47 = vadd.f32 %v1463_v42, %v2010_v58  ;;  %v1466_v48 = vadd.f32 %v1465_v46, %v1464_v43  ;;  %1570 = vmatmul.mubr.bf16.gmra.mrb[24].mxu1 %v750_v44 }
 0x12b   :  { %v694_v49 = vadd.f32 %v1466_v48, %v2010_v58  ;;  %v725_v50 = vmax.f32 %v693_v47, 0.0 }
 0x12d   :  { %v726_v51 = vmax.f32 %v694_v49, 0.0  ;;  %v1467_v52 = vpop.f32.mrb[28].mxu0  ;;  %v2059_v49 = vld [vmem:[%s2449_s4] ss:$0 sm:$0xff] }
 0x12e   :  { %v1468_v53 = vpop.f32.mrb[29].mxu0 }
 0x12f   :  { %v1469_v54 = vadd.f32 %v1468_v53, %v1467_v52  ;;  %v1470_v55 = vpop.f32.mrb[30].mxu0  ;;  %v751_v56 = vpack.c.bf16 %v726_v51, %v725_v50 }
 0x130   :  { %v1471_v57 = vpop.f32.mrb[31].mxu0 }
 0x131   :  { %v695_v59 = vadd.f32 %v1469_v54, %v2010_v58  ;;  %v1472_v60 = vadd.f32 %v1471_v57, %v1470_v55  ;;  %1573 = vmatprep.mubr.bf16.mxu1 %v751_v56 }
 0x133   :  { %v696_v61 = vadd.f32 %v1472_v60, %v2010_v58  ;;  %v727_v62 = vmax.f32 %v695_v59, 0.0 }
 0x135   :  { %v728_v63 = vmax.f32 %v696_v61, 0.0  ;;  %v1473_v0 = vpop.f32.mrb[32].mxu0 }
 0x136   :  { %v1474_v1 = vpop.f32.mrb[33].mxu0 }
 0x137   :  { %v1475_v2 = vadd.f32 %v1474_v1, %v1473_v0  ;;  %v1476_v3 = vpop.f32.mrb[34].mxu0  ;;  %v752_v5 = vpack.c.bf16 %v728_v63, %v727_v62 }
 0x138   :  { %v1477_v6 = vpop.f32.mrb[35].mxu0 }
 0x139   :  { %v697_v7 = vadd.f32 %v1475_v2, %v2010_v58  ;;  %v1478_v8 = vadd.f32 %v1477_v6, %v1476_v3  ;;  %1574 = vmatmul.mubr.bf16.gmra.mrb[28].mxu1 %v752_v5 }
 0x13b   :  { %v698_v9 = vadd.f32 %v1478_v8, %v2010_v58  ;;  %v729_v10 = vmax.f32 %v697_v7, 0.0 }
 0x13d   :  { %v730_v11 = vmax.f32 %v698_v9, 0.0  ;;  %v1479_v12 = vpop.f32.mrb[36].mxu0 }
 0x13e   :  { %v1480_v13 = vpop.f32.mrb[37].mxu0 }
 0x13f   :  { %v1481_v14 = vadd.f32 %v1480_v13, %v1479_v12  ;;  %v1482_v15 = vpop.f32.mrb[38].mxu0  ;;  %v753_v16 = vpack.c.bf16 %v730_v11, %v729_v10 }
 0x140   :  { %v1483_v17 = vpop.f32.mrb[39].mxu0 }
 0x141   :  { %v699_v18 = vadd.f32 %v1481_v14, %v2010_v58  ;;  %v1484_v19 = vadd.f32 %v1483_v17, %v1482_v15  ;;  %1577 = vmatprep.mubr.bf16.mxu1 %v753_v16 }
 0x143   :  { %v700_v20 = vadd.f32 %v1484_v19, %v2010_v58  ;;  %v731_v21 = vmax.f32 %v699_v18, 0.0 }
 0x145   :  { %v732_v24 = vmax.f32 %v700_v20, 0.0  ;;  %v1485_v25 = vpop.f32.mrb[40].mxu0 }
 0x146   :  { %v1486_v26 = vpop.f32.mrb[41].mxu0 }
 0x147   :  { %v1487_v27 = vadd.f32 %v1486_v26, %v1485_v25  ;;  %v1488_v28 = vpop.f32.mrb[42].mxu0  ;;  %v754_v29 = vpack.c.bf16 %v732_v24, %v731_v21 }
 0x148   :  { %v1489_v30 = vpop.f32.mrb[43].mxu0 }
 0x149   :  { %v701_v31 = vadd.f32 %v1487_v27, %v2010_v58  ;;  %v1490_v32 = vadd.f32 %v1489_v30, %v1488_v28  ;;  %1578 = vmatmul.mubr.bf16.gmra.mrb[32].mxu1 %v754_v29 }
 0x14b   :  { %v702_v33 = vadd.f32 %v1490_v32, %v2010_v58  ;;  %v733_v34 = vmax.f32 %v701_v31, 0.0 }
 0x14d   :  { %v734_v35 = vmax.f32 %v702_v33, 0.0  ;;  %v1491_v36 = vpop.f32.mrb[44].mxu0 }
 0x14e   :  { %v1492_v37 = vpop.f32.mrb[45].mxu0 }
 0x14f   :  { %v1493_v38 = vadd.f32 %v1492_v37, %v1491_v36  ;;  %v1494_v39 = vpop.f32.mrb[46].mxu0  ;;  %v755_v40 = vpack.c.bf16 %v734_v35, %v733_v34 }
 0x150   :  { %v1495_v41 = vpop.f32.mrb[47].mxu0 }
 0x151   :  { %v703_v42 = vadd.f32 %v1493_v38, %v2010_v58  ;;  %v1496_v43 = vadd.f32 %v1495_v41, %v1494_v39  ;;  %1581 = vmatprep.mubr.bf16.mxu1 %v755_v40 }
 0x153   :  { %v704_v44 = vadd.f32 %v1496_v43, %v2010_v58  ;;  %v735_v46 = vmax.f32 %v703_v42, 0.0 }
 0x155   :  { %v736_v47 = vmax.f32 %v704_v44, 0.0 }
 0x157   :  { %v756_v48 = vpack.c.bf16 %v736_v47, %v735_v46 }
 0x159   :  { %1582 = vmatmul.mubr.bf16.gmra.mrb[36].mxu1 %v756_v48 }
 0x15a   :  { %1585 = vmatprep.mubr.bf16.mxu1 %v2016_v23 }
 0x161   :  { %1586 = vmatmul.mubr.bf16.gmra.mrb[40].mxu1 %v2022_v45 }
 0x162   :  { %1589 = vmatprep.mubr.bf16.mxu1 %v2028_v4 }
 0x169   :  { %1590 = vmatmul.mubr.bf16.gmra.mrb[44].mxu1 %v2034_v22 }
 0x1dc   :  { %v1563_v50 = vpop.f32.mrb[16].mxu1 }
 0x1dd   :  { %v2062_v58 = vadd.f32 %v1563_v50, %v2059_v49  ;;  %v866_v51 = vpop.f32.mrb[17].mxu1 }
 0x1de   :  { %v2065_v52 = vadd.f32 %v2059_v49, %v866_v51  ;;  %v1564_v23 = vpop.f32.mrb[18].mxu1 }
 0x1df   :  { %997 = vmax.xlane.f32.xlu1 %v2062_v58  ;;  %v869_v45 = vpop.f32.mrb[19].mxu1  ;;  %v2070_v4 = vadd.f32 %v1564_v23, %v2059_v49 }
 0x1e0   :  { %993 = vmax.xlane.f32.xlu0 %v2065_v52  ;;  %v2073_v22 = vadd.f32 %v2059_v49, %v869_v45 }
 0x1e3   :  { %999 = vmax.xlane.f32.xlu1 %v2070_v4 }
 0x1e4   :  { %995 = vmax.xlane.f32.xlu0 %v2073_v22 }
 0x1ec   :  { %v1567_v53 = vpop.f32.mrb[20].mxu1 }
 0x1ed   :  { %v2078_v54 = vadd.f32 %v1567_v53, %v2059_v49  ;;  %v882_v55 = vpop.f32.mrb[21].mxu1 }
 0x1ee   :  { %v1568_v56 = vpop.f32.mrb[22].mxu1  ;;  %v2085_v60 = vadd.f32 %v2059_v49, %v882_v55 }
 0x1ef   :  { %v2081_v57 = vadd.f32 %v1568_v56, %v2059_v49  ;;  %v885_v59 = vpop.f32.mrb[23].mxu1  ;;  %1005 = vmax.xlane.f32.xlu0 %v2078_v54 }
 0x1f0   :  { %v2089_v61 = vadd.f32 %v2059_v49, %v885_v59 }
 0x1f1   :  { %1007 = vmax.xlane.f32.xlu1 %v2081_v57 }
 0x1f3   :  { %1001 = vmax.xlane.f32.xlu0 %v2085_v60 }
 0x1f5   :  { %1003 = vmax.xlane.f32.xlu1 %v2089_v61 }
 0x1fc   :  { %v1571_v62 = vpop.f32.mrb[24].mxu1 }
 0x1fd   :  { %v2094_v63 = vadd.f32 %v1571_v62, %v2059_v49  ;;  %v898_v0 = vpop.f32.mrb[25].mxu1 }
 0x1fe   :  { %v1572_v1 = vpop.f32.mrb[26].mxu1  ;;  %v2101_v5 = vadd.f32 %v2059_v49, %v898_v0 }
 0x1ff   :  { %v2097_v2 = vadd.f32 %v1572_v1, %v2059_v49  ;;  %v901_v3 = vpop.f32.mrb[27].mxu1  ;;  %1013 = vmax.xlane.f32.xlu0 %v2094_v63 }
 0x200   :  { %v2105_v6 = vadd.f32 %v2059_v49, %v901_v3 }
 0x201   :  { %1015 = vmax.xlane.f32.xlu1 %v2097_v2 }
 0x203   :  { %1009 = vmax.xlane.f32.xlu0 %v2101_v5 }
 0x205   :  { %1011 = vmax.xlane.f32.xlu1 %v2105_v6 }
 0x20c   :  { %v1575_v7 = vpop.f32.mrb[28].mxu1 }
 0x20d   :  { %v2110_v8 = vadd.f32 %v1575_v7, %v2059_v49  ;;  %v914_v9 = vpop.f32.mrb[29].mxu1 }
 0x20e   :  { %v1576_v10 = vpop.f32.mrb[30].mxu1  ;;  %v2117_v13 = vadd.f32 %v2059_v49, %v914_v9 }
 0x20f   :  { %v2113_v11 = vadd.f32 %v1576_v10, %v2059_v49  ;;  %v917_v12 = vpop.f32.mrb[31].mxu1  ;;  %1021 = vmax.xlane.f32.xlu0 %v2110_v8 }
 0x210   :  { %v2121_v14 = vadd.f32 %v2059_v49, %v917_v12 }
 0x211   :  { %1023 = vmax.xlane.f32.xlu1 %v2113_v11 }
 0x213   :  { %1017 = vmax.xlane.f32.xlu0 %v2117_v13 }
 0x215   :  { %1019 = vmax.xlane.f32.xlu1 %v2121_v14 }
 0x21c   :  { %v1579_v15 = vpop.f32.mrb[32].mxu1 }
 0x21d   :  { %v2126_v16 = vadd.f32 %v1579_v15, %v2059_v49  ;;  %v930_v17 = vpop.f32.mrb[33].mxu1 }
 0x21e   :  { %v1580_v18 = vpop.f32.mrb[34].mxu1  ;;  %v2133_v21 = vadd.f32 %v2059_v49, %v930_v17 }
 0x21f   :  { %v2129_v19 = vadd.f32 %v1580_v18, %v2059_v49  ;;  %v933_v20 = vpop.f32.mrb[35].mxu1  ;;  %1029 = vmax.xlane.f32.xlu0 %v2126_v16 }
 0x220   :  { %v2137_v24 = vadd.f32 %v2059_v49, %v933_v20 }
 0x221   :  { %1031 = vmax.xlane.f32.xlu1 %v2129_v19 }
 0x223   :  { %1025 = vmax.xlane.f32.xlu0 %v2133_v21 }
 0x225   :  { %1027 = vmax.xlane.f32.xlu1 %v2137_v24 }
 0x22c   :  { %v1583_v25 = vpop.f32.mrb[36].mxu1 }
 0x22d   :  { %v2142_v26 = vadd.f32 %v1583_v25, %v2059_v49  ;;  %v946_v27 = vpop.f32.mrb[37].mxu1 }
 0x22e   :  { %v1584_v28 = vpop.f32.mrb[38].mxu1  ;;  %v2149_v31 = vadd.f32 %v2059_v49, %v946_v27 }
 0x22f   :  { %v2145_v29 = vadd.f32 %v1584_v28, %v2059_v49  ;;  %v949_v30 = vpop.f32.mrb[39].mxu1  ;;  %1037 = vmax.xlane.f32.xlu0 %v2142_v26 }
 0x230   :  { %v2153_v32 = vadd.f32 %v2059_v49, %v949_v30 }
 0x231   :  { %1039 = vmax.xlane.f32.xlu1 %v2145_v29 }
 0x233   :  { %1033 = vmax.xlane.f32.xlu0 %v2149_v31 }
 0x234   :  { %v1587_v33 = vpop.f32.mrb[40].mxu1 }
 0x235   :  { %v2157_v34 = vadd.f32 %v1587_v33, %v2059_v49  ;;  %v962_v35 = vpop.f32.mrb[41].mxu1  ;;  %1035 = vmax.xlane.f32.xlu1 %v2153_v32 }
 0x236   :  { %v1588_v36 = vpop.f32.mrb[42].mxu1  ;;  %v2165_v39 = vadd.f32 %v2059_v49, %v962_v35 }
 0x237   :  { %v2161_v37 = vadd.f32 %v1588_v36, %v2059_v49  ;;  %v965_v38 = vpop.f32.mrb[43].mxu1  ;;  %1045 = vmax.xlane.f32.xlu0 %v2157_v34 }
 0x238   :  { %v2169_v40 = vadd.f32 %v2059_v49, %v965_v38 }
 0x239   :  { %1047 = vmax.xlane.f32.xlu1 %v2161_v37 }
 0x23b   :  { %1041 = vmax.xlane.f32.xlu0 %v2165_v39 }
 0x23c   :  { %v1591_v41 = vpop.f32.mrb[44].mxu1 }
 0x23d   :  { %v978_v42 = vpop.f32.mrb[45].mxu1  ;;  %1043 = vmax.xlane.f32.xlu1 %v2169_v40  ;;  %v2181_v48 = vadd.f32 %v1591_v41, %v2059_v49 }
 0x23e   :  { %v2174_v43 = vadd.f32 %v2059_v49, %v978_v42  ;;  %v1592_v44 = vpop.f32.mrb[46].mxu1 }
 0x23f   :  { %v981_v46 = vpop.f32.mrb[47].mxu1  ;;  %v2185_v50 = vadd.f32 %v1592_v44, %v2059_v49 }
 0x240   :  { %v2177_v47 = vadd.f32 %v2059_v49, %v981_v46  ;;  %1049 = vmax.xlane.f32.xlu0 %v2174_v43 }
 0x242   :  { %1051 = vmax.xlane.f32.xlu1 %v2177_v47 }
 0x244   :  { %1053 = vmax.xlane.f32.xlu0 %v2181_v48 }
 0x246   :  { %1055 = vmax.xlane.f32.xlu1 %v2185_v50 }
 0x26c   :  { %v998_v51 = vpop.xlane.xlu1 %997 }
 0x26d   :  { %v2190_v23 = vsub.f32 %v2062_v58, %v998_v51  ;;  %v994_v45 = vpop.xlane.xlu0 %993 }
 0x26e   :  { %v2193_v53 = vsub.f32 %v2065_v52, %v994_v45 }
 0x26f   :  { %v1093_v55 = vmul.f32 1.442695, %v2190_v23 }
 0x270   :  { %v1089_v56 = vmul.f32 1.442695, %v2193_v53  ;;  %v1000_v59 = vpop.xlane.xlu1 %999 }
 0x271   :  { %1681 = vpow2.f32 %v1093_v55  ;;  %v2198_v49 = vsub.f32 %v2070_v4, %v1000_v59  ;;  %v996_v62 = vpop.xlane.xlu0 %995 }
 0x272   :  { %v2201_v0 = vsub.f32 %v2073_v22, %v996_v62  ;;  %1683 = vpow2.f32 %v1089_v56 }
 0x273   :  { %v1095_v58 = vmul.f32 1.442695, %v2198_v49 }
 0x274   :  { %v1091_v52 = vmul.f32 1.442695, %v2201_v0 }
 0x275   :  { %1685 = vpow2.f32 %v1095_v58 }
 0x276   :  { %1687 = vpow2.f32 %v1091_v52 }
 0x27b   :  { %v1682_v1 = vpop.eup %1681 }
 0x27c   :  { %1157 = vadd.xlane.f32.xlu0 %v1682_v1  ;;  %v1006_v3 = vpop.xlane.xlu0 %1005  ;;  %v1684_v9 = vpop.eup %1683 }
 0x27d   :  { %v2206_v7 = vsub.f32 %v2078_v54, %v1006_v3 }
 0x27e   :  { %v1008_v4 = vpop.xlane.xlu1 %1007 }
 0x27f   :  { %v1686_v10 = vpop.eup %1685  ;;  %v1101_v12 = vmul.f32 1.442695, %v2206_v7  ;;  %v2210_v22 = vsub.f32 %v2081_v57, %v1008_v4 }
 0x280   :  { %1159 = vadd.xlane.f32.xlu1 %v1686_v10  ;;  %1153 = vadd.xlane.f32.xlu0 %v1684_v9  ;;  %v1002_v15 = vpop.xlane.xlu0 %1001  ;;  %v1688_v54 = vpop.eup %1687 }
 0x281   :  { %1689 = vpow2.f32 %v1101_v12  ;;  %v1103_v17 = vmul.f32 1.442695, %v2210_v22  ;;  %v2214_v18 = vsub.f32 %v2085_v60, %v1002_v15 }
 0x282   :  { %v1004_v20 = vpop.xlane.xlu1 %1003 }
 0x283   :  { %1691 = vpow2.f32 %v1103_v17  ;;  %v1097_v25 = vmul.f32 1.442695, %v2214_v18  ;;  %v2218_v27 = vsub.f32 %v2089_v61, %v1004_v20 }
 0x284   :  { %1155 = vadd.xlane.f32.xlu1 %v1688_v54 }
 0x285   :  { %1693 = vpow2.f32 %v1097_v25  ;;  %v1099_v57 = vmul.f32 1.442695, %v2218_v27 }
 0x287   :  { %1695 = vpow2.f32 %v1099_v57 }
 0x28b   :  { %v1690_v28 = vpop.eup %1689 }
 0x28c   :  { %1165 = vadd.xlane.f32.xlu0 %v1690_v28  ;;  %v1014_v30 = vpop.xlane.xlu0 %1013 }
 0x28d   :  { %v1692_v33 = vpop.eup %1691  ;;  %v2222_v60 = vsub.f32 %v2094_v63, %v1014_v30 }
 0x28e   :  { %v1016_v35 = vpop.xlane.xlu1 %1015  ;;  %1167 = vadd.xlane.f32.xlu1 %v1692_v33 }
 0x28f   :  { %v1694_v36 = vpop.eup %1693  ;;  %v1109_v38 = vmul.f32 1.442695, %v2222_v60  ;;  %v2226_v61 = vsub.f32 %v2097_v2, %v1016_v35 }
 0x290   :  { %1161 = vadd.xlane.f32.xlu0 %v1694_v36  ;;  %v1010_v41 = vpop.xlane.xlu0 %1009 }
 0x291   :  { %v1696_v42 = vpop.eup %1695  ;;  %1697 = vpow2.f32 %v1109_v38  ;;  %v1111_v44 = vmul.f32 1.442695, %v2226_v61  ;;  %v2230_v46 = vsub.f32 %v2101_v5, %v1010_v41 }
 0x292   :  { %v1012_v51 = vpop.xlane.xlu1 %1011  ;;  %1163 = vadd.xlane.f32.xlu1 %v1696_v42 }
 0x293   :  { %1699 = vpow2.f32 %v1111_v44  ;;  %v1105_v63 = vmul.f32 1.442695, %v2230_v46  ;;  %v2234_v45 = vsub.f32 %v2105_v6, %v1012_v51 }
 0x295   :  { %1701 = vpow2.f32 %v1105_v63  ;;  %v1107_v2 = vmul.f32 1.442695, %v2234_v45 }
 0x297   :  { %1703 = vpow2.f32 %v1107_v2 }
 0x29b   :  { %v1698_v55 = vpop.eup %1697 }
 0x29c   :  { %1173 = vadd.xlane.f32.xlu0 %v1698_v55  ;;  %v1022_v56 = vpop.xlane.xlu0 %1021 }
 0x29d   :  { %v1700_v59 = vpop.eup %1699  ;;  %v2238_v62 = vsub.f32 %v2110_v8, %v1022_v56 }
 0x29e   :  { %v1024_v5 = vpop.xlane.xlu1 %1023  ;;  %1175 = vadd.xlane.f32.xlu1 %v1700_v59 }
 0x29f   :  { %v1702_v58 = vpop.eup %1701  ;;  %v1117_v52 = vmul.f32 1.442695, %v2238_v62  ;;  %v2242_v1 = vsub.f32 %v2113_v11, %v1024_v5 }
 0x2a0   :  { %1169 = vadd.xlane.f32.xlu0 %v1702_v58  ;;  %v1018_v6 = vpop.xlane.xlu0 %1017 }
 0x2a1   :  { %v1704_v3 = vpop.eup %1703  ;;  %1705 = vpow2.f32 %v1117_v52  ;;  %v1119_v9 = vmul.f32 1.442695, %v2242_v1  ;;  %v2246_v4 = vsub.f32 %v2117_v13, %v1018_v6 }
 0x2a2   :  { %v1020_v10 = vpop.xlane.xlu1 %1019  ;;  %1171 = vadd.xlane.f32.xlu1 %v1704_v3 }
 0x2a3   :  { %1707 = vpow2.f32 %v1119_v9  ;;  %v1113_v8 = vmul.f32 1.442695, %v2246_v4  ;;  %v2250_v12 = vsub.f32 %v2121_v14, %v1020_v10 }
 0x2a5   :  { %1709 = vpow2.f32 %v1113_v8  ;;  %v1115_v11 = vmul.f32 1.442695, %v2250_v12 }
 0x2a7   :  { %1711 = vpow2.f32 %v1115_v11 }
 0x2ab   :  { %v1706_v15 = vpop.eup %1705 }
 0x2ac   :  { %1181 = vadd.xlane.f32.xlu0 %v1706_v15  ;;  %v1030_v17 = vpop.xlane.xlu0 %1029 }
 0x2ad   :  { %v1708_v20 = vpop.eup %1707  ;;  %v2254_v54 = vsub.f32 %v2126_v16, %v1030_v17 }
 0x2ae   :  { %v1032_v13 = vpop.xlane.xlu1 %1031  ;;  %1183 = vadd.xlane.f32.xlu1 %v1708_v20 }
 0x2af   :  { %v1710_v25 = vpop.eup %1709  ;;  %v1125_v57 = vmul.f32 1.442695, %v2254_v54  ;;  %v2258_v28 = vsub.f32 %v2129_v19, %v1032_v13 }
 0x2b0   :  { %1177 = vadd.xlane.f32.xlu0 %v1710_v25  ;;  %v1026_v14 = vpop.xlane.xlu0 %1025 }
 0x2b1   :  { %v1712_v30 = vpop.eup %1711  ;;  %1713 = vpow2.f32 %v1125_v57  ;;  %v1127_v33 = vmul.f32 1.442695, %v2258_v28  ;;  %v2262_v35 = vsub.f32 %v2133_v21, %v1026_v14 }
 0x2b2   :  { %v1028_v36 = vpop.xlane.xlu1 %1027  ;;  %1179 = vadd.xlane.f32.xlu1 %v1712_v30 }
 0x2b3   :  { %1715 = vpow2.f32 %v1127_v33  ;;  %v1121_v16 = vmul.f32 1.442695, %v2262_v35  ;;  %v2266_v38 = vsub.f32 %v2137_v24, %v1028_v36 }
 0x2b5   :  { %1717 = vpow2.f32 %v1121_v16  ;;  %v1123_v19 = vmul.f32 1.442695, %v2266_v38 }
 0x2b7   :  { %1719 = vpow2.f32 %v1123_v19 }
 0x2bb   :  { %v1714_v41 = vpop.eup %1713 }
 0x2bc   :  { %1189 = vadd.xlane.f32.xlu0 %v1714_v41  ;;  %v1038_v42 = vpop.xlane.xlu0 %1037 }
 0x2bd   :  { %v1716_v44 = vpop.eup %1715  ;;  %v2270_v51 = vsub.f32 %v2142_v26, %v1038_v42 }
 0x2be   :  { %v1040_v21 = vpop.xlane.xlu1 %1039  ;;  %1191 = vadd.xlane.f32.xlu1 %v1716_v44 }
 0x2bf   :  { %v1718_v63 = vpop.eup %1717  ;;  %v1133_v2 = vmul.f32 1.442695, %v2270_v51  ;;  %v2274_v55 = vsub.f32 %v2145_v29, %v1040_v21 }
 0x2c0   :  { %1185 = vadd.xlane.f32.xlu0 %v1718_v63  ;;  %v1034_v24 = vpop.xlane.xlu0 %1033 }
 0x2c1   :  { %v1720_v56 = vpop.eup %1719  ;;  %1721 = vpow2.f32 %v1133_v2  ;;  %v1135_v59 = vmul.f32 1.442695, %v2274_v55  ;;  %v2278_v5 = vsub.f32 %v2149_v31, %v1034_v24 }
 0x2c2   :  { %v1036_v58 = vpop.xlane.xlu1 %1035  ;;  %1187 = vadd.xlane.f32.xlu1 %v1720_v56 }
 0x2c3   :  { %1723 = vpow2.f32 %v1135_v59  ;;  %v1129_v26 = vmul.f32 1.442695, %v2278_v5  ;;  %v2282_v52 = vsub.f32 %v2153_v32, %v1036_v58 }
 0x2c4   :  { %v1046_v6 = vpop.xlane.xlu0 %1045 }
 0x2c5   :  { %1725 = vpow2.f32 %v1129_v26  ;;  %v1131_v29 = vmul.f32 1.442695, %v2282_v52  ;;  %v2286_v3 = vsub.f32 %v2157_v34, %v1046_v6 }
 0x2c6   :  { %v1048_v9 = vpop.xlane.xlu1 %1047 }
 0x2c7   :  { %1727 = vpow2.f32 %v1131_v29  ;;  %v1141_v31 = vmul.f32 1.442695, %v2286_v3  ;;  %v2290_v10 = vsub.f32 %v2161_v37, %v1048_v9 }
 0x2c8   :  { %v1042_v8 = vpop.xlane.xlu0 %1041 }
 0x2c9   :  { %1729 = vpow2.f32 %v1141_v31  ;;  %v1143_v11 = vmul.f32 1.442695, %v2290_v10  ;;  %v2294_v32 = vsub.f32 %v2165_v39, %v1042_v8 }
 0x2ca   :  { %v1044_v15 = vpop.xlane.xlu1 %1043 }
 0x2cb   :  { %v1722_v17 = vpop.eup %1721  ;;  %1731 = vpow2.f32 %v1143_v11  ;;  %v1137_v34 = vmul.f32 1.442695, %v2294_v32  ;;  %v2298_v20 = vsub.f32 %v2169_v40, %v1044_v15 }
 0x2cc   :  { %1197 = vadd.xlane.f32.xlu0 %v1722_v17 }
 0x2cd   :  { %v1724_v13 = vpop.eup %1723  ;;  %1733 = vpow2.f32 %v1137_v34  ;;  %v1139_v37 = vmul.f32 1.442695, %v2298_v20  ;;  %v1050_v25 = vpop.xlane.xlu0 %1049 }
 0x2ce   :  { %v2302_v57 = vsub.f32 %v2174_v43, %v1050_v25  ;;  %1199 = vadd.xlane.f32.xlu1 %v1724_v13 }
 0x2cf   :  { %v1726_v39 = vpop.eup %1725  ;;  %1735 = vpow2.f32 %v1139_v37  ;;  %v1052_v14 = vpop.xlane.xlu1 %1051 }
 0x2d0   :  { %v1145_v30 = vmul.f32 1.442695, %v2302_v57  ;;  %v2306_v33 = vsub.f32 %v2177_v47, %v1052_v14  ;;  %1193 = vadd.xlane.f32.xlu0 %v1726_v39 }
 0x2d1   :  { %v1728_v40 = vpop.eup %1727  ;;  %v1054_v36 = vpop.xlane.xlu0 %1053 }
 0x2d2   :  { %1737 = vpow2.f32 %v1145_v30  ;;  %v1147_v16 = vmul.f32 1.442695, %v2306_v33  ;;  %v2310_v19 = vsub.f32 %v2181_v48, %v1054_v36  ;;  %1195 = vadd.xlane.f32.xlu1 %v1728_v40 }
 0x2d3   :  { %v1730_v43 = vpop.eup %1729  ;;  %v1056_v41 = vpop.xlane.xlu1 %1055 }
 0x2d4   :  { %1739 = vpow2.f32 %v1147_v16  ;;  %v1149_v42 = vmul.f32 1.442695, %v2310_v19  ;;  %v2314_v44 = vsub.f32 %v2185_v50, %v1056_v41  ;;  %1205 = vadd.xlane.f32.xlu0 %v1730_v43 }
 0x2d5   :  { %v1732_v47 = vpop.eup %1731 }
 0x2d6   :  { %1741 = vpow2.f32 %v1149_v42  ;;  %v1151_v21 = vmul.f32 1.442695, %v2314_v44  ;;  %1207 = vadd.xlane.f32.xlu1 %v1732_v47 }
 0x2d7   :  { %v1734_v63 = vpop.eup %1733 }
 0x2d8   :  { %1743 = vpow2.f32 %v1151_v21  ;;  %1201 = vadd.xlane.f32.xlu0 %v1734_v63 }
 0x2d9   :  { %v1736_v48 = vpop.eup %1735 }
 0x2da   :  { %1203 = vadd.xlane.f32.xlu1 %v1736_v48 }
 0x2dc   :  { %v1738_v2 = vpop.eup %1737 }
 0x2dd   :  { %1209 = vadd.xlane.f32.xlu0 %v1738_v2 }
 0x2de   :  { %v1740_v24 = vpop.eup %1739 }
 0x2df   :  { %1211 = vadd.xlane.f32.xlu1 %v1740_v24 }
 0x2e0   :  { %v1742_v56 = vpop.eup %1741 }
 0x2e1   :  { %1213 = vadd.xlane.f32.xlu0 %v1742_v56 }
 0x2e2   :  { %v1744_v59 = vpop.eup %1743 }
 0x2e3   :  { %1215 = vadd.xlane.f32.xlu1 %v1744_v59 }
 0x309   :  { %v1158_v50 = vpop.xlane.xlu0 %1157 }
 0x30a   :  { %1745 = vlog2.f32 %v1158_v50 }
 0x30d   :  { %v1160_v58 = vpop.xlane.xlu1 %1159  ;;  %v1154_v26 = vpop.xlane.xlu0 %1153 }
 0x30e   :  { %1747 = vlog2.f32 %v1160_v58 }
 0x30f   :  { %1749 = vlog2.f32 %v1154_v26 }
 0x311   :  { %v1156_v6 = vpop.xlane.xlu1 %1155 }
 0x312   :  { %1751 = vlog2.f32 %v1156_v6 }
 0x314   :  { %v1746_v29 = vpop.eup %1745 }
 0x315   :  { %v1222_v9 = vmul.f32 0.6931472, %v1746_v29 }
 0x317   :  { %v1283_v31 = vsub.f32 %v2190_v23, %v1222_v9 }
 0x318   :  { %v1748_v8 = vpop.eup %1747 }
 0x319   :  { %v1750_v11 = vpop.eup %1749  ;;  %1315 = vst [vmem:[%s2450_s5 + $0x10] sm:$0xff] %v1283_v31  ;;  %v1224_v15 = vmul.f32 0.6931472, %v1748_v8  ;;  %v1166_v17 = vpop.xlane.xlu0 %1165 }
 0x31a   :  { %v1218_v34 = vmul.f32 0.6931472, %v1750_v11  ;;  %1753 = vlog2.f32 %v1166_v17 }
 0x31b   :  { %v1284_v13 = vsub.f32 %v2198_v49, %v1224_v15  ;;  %v1168_v37 = vpop.xlane.xlu1 %1167 }
 0x31c   :  { %v1752_v25 = vpop.eup %1751  ;;  %v1281_v39 = vsub.f32 %v2193_v53, %v1218_v34  ;;  %1755 = vlog2.f32 %v1168_v37 }
 0x31d   :  { %1316 = vst [vmem:[%s2450_s5 + $0x18] sm:$0xff] %v1284_v13  ;;  %v1220_v23 = vmul.f32 0.6931472, %v1752_v25  ;;  %v1162_v14 = vpop.xlane.xlu0 %1161 }
 0x31e   :  { %1313 = vst [vmem:[%s2450_s5] sm:$0xff] %v1281_v39  ;;  %1757 = vlog2.f32 %v1162_v14 }
 0x31f   :  { %v1282_v30 = vsub.f32 %v2201_v0, %v1220_v23  ;;  %v1164_v40 = vpop.xlane.xlu1 %1163 }
 0x320   :  { %1759 = vlog2.f32 %v1164_v40 }
 0x321   :  { %1314 = vst [vmem:[%s2450_s5 + $0x8] sm:$0xff] %v1282_v30 }
 0x324   :  { %v1754_v53 = vpop.eup %1753 }
 0x325   :  { %v1230_v49 = vmul.f32 0.6931472, %v1754_v53 }
 0x326   :  { %v1756_v36 = vpop.eup %1755 }
 0x327   :  { %v1287_v16 = vsub.f32 %v2206_v7, %v1230_v49  ;;  %v1232_v43 = vmul.f32 0.6931472, %v1756_v36 }
 0x328   :  { %v1758_v41 = vpop.eup %1757 }
 0x329   :  { %1319 = vst [vmem:[%s2450_s5 + $0x30] sm:$0xff] %v1287_v16  ;;  %v1288_v42 = vsub.f32 %v2210_v22, %v1232_v43  ;;  %v1226_v0 = vmul.f32 0.6931472, %v1758_v41  ;;  %v1174_v47 = vpop.xlane.xlu0 %1173 }
 0x32a   :  { %v1760_v21 = vpop.eup %1759  ;;  %1761 = vlog2.f32 %v1174_v47 }
 0x32b   :  { %1320 = vst [vmem:[%s2450_s5 + $0x38] sm:$0xff] %v1288_v42  ;;  %v1285_v63 = vsub.f32 %v2214_v18, %v1226_v0  ;;  %v1228_v48 = vmul.f32 0.6931472, %v1760_v21  ;;  %v1176_v7 = vpop.xlane.xlu1 %1175 }
 0x32c   :  { %1763 = vlog2.f32 %v1176_v7 }
 0x32d   :  { %1317 = vst [vmem:[%s2450_s5 + $0x20] sm:$0xff] %v1285_v63  ;;  %v1286_v2 = vsub.f32 %v2218_v27, %v1228_v48  ;;  %v1170_v22 = vpop.xlane.xlu0 %1169 }
 0x32e   :  { %1765 = vlog2.f32 %v1170_v22 }
 0x32f   :  { %1318 = vst [vmem:[%s2450_s5 + $0x28] sm:$0xff] %v1286_v2  ;;  %v1172_v24 = vpop.xlane.xlu1 %1171 }
 0x330   :  { %1767 = vlog2.f32 %v1172_v24 }
 0x334   :  { %v1762_v56 = vpop.eup %1761 }
 0x335   :  { %v1238_v59 = vmul.f32 0.6931472, %v1762_v56 }
 0x336   :  { %v1764_v18 = vpop.eup %1763 }
 0x337   :  { %v1291_v50 = vsub.f32 %v2222_v60, %v1238_v59  ;;  %v1240_v58 = vmul.f32 0.6931472, %v1764_v18 }
 0x338   :  { %v1766_v26 = vpop.eup %1765 }
 0x339   :  { %1323 = vst [vmem:[%s2450_s5 + $0x50] sm:$0xff] %v1291_v50  ;;  %v1292_v27 = vsub.f32 %v2226_v61, %v1240_v58  ;;  %v1234_v6 = vmul.f32 0.6931472, %v1766_v26  ;;  %v1182_v29 = vpop.xlane.xlu0 %1181 }
 0x33a   :  { %v1768_v9 = vpop.eup %1767  ;;  %1769 = vlog2.f32 %v1182_v29 }
 0x33b   :  { %1324 = vst [vmem:[%s2450_s5 + $0x58] sm:$0xff] %v1292_v27  ;;  %v1289_v31 = vsub.f32 %v2230_v46, %v1234_v6  ;;  %v1236_v8 = vmul.f32 0.6931472, %v1768_v9  ;;  %v1184_v60 = vpop.xlane.xlu1 %1183 }
 0x33c   :  { %1771 = vlog2.f32 %v1184_v60 }
 0x33d   :  { %1321 = vst [vmem:[%s2450_s5 + $0x40] sm:$0xff] %v1289_v31  ;;  %v1290_v11 = vsub.f32 %v2234_v45, %v1236_v8  ;;  %v1178_v61 = vpop.xlane.xlu0 %1177 }
 0x33e   :  { %1773 = vlog2.f32 %v1178_v61 }
 0x33f   :  { %1322 = vst [vmem:[%s2450_s5 + $0x48] sm:$0xff] %v1290_v11  ;;  %v1180_v15 = vpop.xlane.xlu1 %1179 }
 0x340   :  { %1775 = vlog2.f32 %v1180_v15 }
 0x344   :  { %v1770_v17 = vpop.eup %1769 }
 0x345   :  { %v1246_v34 = vmul.f32 0.6931472, %v1770_v17 }
 0x346   :  { %v1772_v46 = vpop.eup %1771 }
 0x347   :  { %v1295_v13 = vsub.f32 %v2238_v62, %v1246_v34  ;;  %v1248_v37 = vmul.f32 0.6931472, %v1772_v46 }
 0x348   :  { %v1774_v25 = vpop.eup %1773 }
 0x349   :  { %1327 = vst [vmem:[%s2450_s5 + $0x70] sm:$0xff] %v1295_v13  ;;  %v1296_v45 = vsub.f32 %v2242_v1, %v1248_v37  ;;  %v1242_v39 = vmul.f32 0.6931472, %v1774_v25  ;;  %v1190_v23 = vpop.xlane.xlu0 %1189 }
 0x34a   :  { %v1776_v14 = vpop.eup %1775  ;;  %1777 = vlog2.f32 %v1190_v23 }
 0x34b   :  { %1328 = vst [vmem:[%s2450_s5 + $0x78] sm:$0xff] %v1296_v45  ;;  %v1293_v30 = vsub.f32 %v2246_v4, %v1242_v39  ;;  %v1244_v40 = vmul.f32 0.6931472, %v1776_v14  ;;  %v1192_v62 = vpop.xlane.xlu1 %1191 }
 0x34c   :  { %1779 = vlog2.f32 %v1192_v62 }
 0x34d   :  { %1325 = vst [vmem:[%s2450_s5 + $0x60] sm:$0xff] %v1293_v30  ;;  %v1294_v53 = vsub.f32 %v2250_v12, %v1244_v40  ;;  %v1186_v1 = vpop.xlane.xlu0 %1185 }
 0x34e   :  { %1781 = vlog2.f32 %v1186_v1 }
 0x34f   :  { %1326 = vst [vmem:[%s2450_s5 + $0x68] sm:$0xff] %v1294_v53  ;;  %v1188_v49 = vpop.xlane.xlu1 %1187 }
 0x350   :  { %1783 = vlog2.f32 %v1188_v49 }
 0x354   :  { %v1778_v36 = vpop.eup %1777 }
 0x355   :  { %v1254_v16 = vmul.f32 0.6931472, %v1778_v36 }
 0x356   :  { %v1780_v4 = vpop.eup %1779 }
 0x357   :  { %v1299_v43 = vsub.f32 %v2254_v54, %v1254_v16  ;;  %v1256_v41 = vmul.f32 0.6931472, %v1780_v4 }
 0x358   :  { %v1782_v42 = vpop.eup %1781 }
 0x359   :  { %1331 = vst [vmem:[%s2450_s5 + $0x90] sm:$0xff] %v1299_v43  ;;  %v1300_v12 = vsub.f32 %v2258_v28, %v1256_v41  ;;  %v1250_v0 = vmul.f32 0.6931472, %v1782_v42  ;;  %v1198_v47 = vpop.xlane.xlu0 %1197 }
 0x35a   :  { %v1784_v21 = vpop.eup %1783  ;;  %1785 = vlog2.f32 %v1198_v47 }
 0x35b   :  { %1332 = vst [vmem:[%s2450_s5 + $0x98] sm:$0xff] %v1300_v12  ;;  %v1297_v63 = vsub.f32 %v2262_v35, %v1250_v0  ;;  %v1252_v48 = vmul.f32 0.6931472, %v1784_v21  ;;  %v1200_v54 = vpop.xlane.xlu1 %1199 }
 0x35c   :  { %1787 = vlog2.f32 %v1200_v54 }
 0x35d   :  { %1329 = vst [vmem:[%s2450_s5 + $0x80] sm:$0xff] %v1297_v63  ;;  %v1298_v7 = vsub.f32 %v2266_v38, %v1252_v48  ;;  %v1194_v28 = vpop.xlane.xlu0 %1193 }
 0x35e   :  { %1789 = vlog2.f32 %v1194_v28 }
 0x35f   :  { %1330 = vst [vmem:[%s2450_s5 + $0x88] sm:$0xff] %v1298_v7  ;;  %v1196_v2 = vpop.xlane.xlu1 %1195 }
 0x360   :  { %1791 = vlog2.f32 %v1196_v2 }
 0x361   :  { %v1206_v22 = vpop.xlane.xlu0 %1205 }
 0x362   :  { %1793 = vlog2.f32 %v1206_v22 }
 0x363   :  { %v1208_v35 = vpop.xlane.xlu1 %1207 }
 0x364   :  { %v1786_v24 = vpop.eup %1785  ;;  %1795 = vlog2.f32 %v1208_v35 }
 0x365   :  { %v1262_v56 = vmul.f32 0.6931472, %v1786_v24  ;;  %v1202_v59 = vpop.xlane.xlu0 %1201 }
 0x366   :  { %v1788_v18 = vpop.eup %1787  ;;  %1797 = vlog2.f32 %v1202_v59 }
 0x367   :  { %v1303_v50 = vsub.f32 %v2270_v51, %v1262_v56  ;;  %v1264_v38 = vmul.f32 0.6931472, %v1788_v18  ;;  %v1204_v58 = vpop.xlane.xlu1 %1203 }
 0x368   :  { %v1790_v26 = vpop.eup %1789  ;;  %1799 = vlog2.f32 %v1204_v58 }
 0x369   :  { %1335 = vst [vmem:[%s2450_s5 + $0xb0] sm:$0xff] %v1303_v50  ;;  %v1304_v27 = vsub.f32 %v2274_v55, %v1264_v38  ;;  %v1258_v6 = vmul.f32 0.6931472, %v1790_v26 }
 0x36a   :  { %v1792_v29 = vpop.eup %1791  ;;  %v1210_v9 = vpop.xlane.xlu0 %1209 }
 0x36b   :  { %1336 = vst [vmem:[%s2450_s5 + $0xb8] sm:$0xff] %v1304_v27  ;;  %v1301_v31 = vsub.f32 %v2278_v5, %v1258_v6  ;;  %v1260_v51 = vmul.f32 0.6931472, %v1792_v29  ;;  %1801 = vlog2.f32 %v1210_v9 }
 0x36c   :  { %v1794_v8 = vpop.eup %1793  ;;  %v1212_v60 = vpop.xlane.xlu1 %1211 }
 0x36d   :  { %1333 = vst [vmem:[%s2450_s5 + $0xa0] sm:$0xff] %v1301_v31  ;;  %v1302_v11 = vsub.f32 %v2282_v52, %v1260_v51  ;;  %v1270_v55 = vmul.f32 0.6931472, %v1794_v8  ;;  %1803 = vlog2.f32 %v1212_v60 }
 0x36e   :  { %v1796_v61 = vpop.eup %1795  ;;  %v1214_v15 = vpop.xlane.xlu0 %1213 }
 0x36f   :  { %1334 = vst [vmem:[%s2450_s5 + $0xa8] sm:$0xff] %v1302_v11  ;;  %v1307_v5 = vsub.f32 %v2286_v3, %v1270_v55  ;;  %v1272_v17 = vmul.f32 0.6931472, %v1796_v61  ;;  %1805 = vlog2.f32 %v1214_v15 }
 0x370   :  { %v1798_v34 = vpop.eup %1797  ;;  %v1216_v46 = vpop.xlane.xlu1 %1215 }
 0x371   :  { %1339 = vst [vmem:[%s2450_s5 + $0xd0] sm:$0xff] %v1307_v5  ;;  %v1308_v52 = vsub.f32 %v2290_v10, %v1272_v17  ;;  %v1266_v13 = vmul.f32 0.6931472, %v1798_v34  ;;  %1807 = vlog2.f32 %v1216_v46 }
 0x372   :  { %v1800_v37 = vpop.eup %1799 }
 0x373   :  { %1340 = vst [vmem:[%s2450_s5 + $0xd8] sm:$0xff] %v1308_v52  ;;  %v1305_v25 = vsub.f32 %v2294_v32, %v1266_v13  ;;  %v1268_v3 = vmul.f32 0.6931472, %v1800_v37 }
 0x375   :  { %v1802_v45 = vpop.eup %1801  ;;  %1337 = vst [vmem:[%s2450_s5 + $0xc0] sm:$0xff] %v1305_v25  ;;  %v1306_v39 = vsub.f32 %v2298_v20, %v1268_v3 }
 0x376   :  { %v1274_v23 = vmul.f32 0.6931472, %v1802_v45 }
 0x377   :  { %v1804_v14 = vpop.eup %1803  ;;  %1338 = vst [vmem:[%s2450_s5 + $0xc8] sm:$0xff] %v1306_v39 }
 0x378   :  { %v1309_v10 = vsub.f32 %v2302_v57, %v1274_v23  ;;  %v1276_v30 = vmul.f32 0.6931472, %v1804_v14 }
 0x379   :  { %v1806_v40 = vpop.eup %1805 }
 0x37a   :  { %1341 = vst [vmem:[%s2450_s5 + $0xe0] sm:$0xff] %v1309_v10  ;;  %v1310_v32 = vsub.f32 %v2306_v33, %v1276_v30  ;;  %v1278_v62 = vmul.f32 0.6931472, %v1806_v40 }
 0x37b   :  { %v1808_v53 = vpop.eup %1807 }
 0x37c   :  { %1342 = vst [vmem:[%s2450_s5 + $0xe8] sm:$0xff] %v1310_v32  ;;  %v1311_v20 = vsub.f32 %v2310_v19, %v1278_v62  ;;  %v1280_v1 = vmul.f32 0.6931472, %v1808_v53 }
 0x37e   :  { %1343 = vst [vmem:[%s2450_s5 + $0xf0] sm:$0xff] %v1311_v20  ;;  %v1312_v57 = vsub.f32 %v2314_v44, %v1280_v1 }
 0x380   :  { %1344 = vst [vmem:[%s2450_s5 + $0xf8] sm:$0xff] %v1312_v57 }

</bundles_post_ra>
